<compile_context>
chip_gen: v5e
topology: v5e:2x2
jax: 0.10.0
libtpu: 0.0.40
codegen_flags: <defaults>
</compile_context>

<pallas_src>
import numpy as np
import jax
import jax.numpy as jnp
from jax.experimental import pallas as pl
from jax.experimental.pallas import tpu as pltpu


def _dft_matrices(H, H_pad, W, Wf_pad, Rt):
    """Real-valued DFT / inverse-DFT matrices for ortho-normalized rfft2/irfft2.

    Returns:
      Mr  : (W, 2*Wf_pad)        rfft along W, [real | imag] lane-concatenated
                                 at a 128-lane boundary (zero-padded lanes).
      Fcs : (2*Rt*H_pad, Rt*H_pad) stacked [Fc ; Fs] block-diag DFT along H
                                 (cos on top, -sin below); also reused for
                                 the inverse H transform.
      Mi  : (2*Wf_pad, W)        irfft along W, [A ; Bm] stacked in rows.
    """
    Wf = W // 2 + 1
    n = np.arange(W)
    k = np.arange(Wf)

    # rfft along W (ortho): real part cos/sqrt(W), imag part -sin/sqrt(W).
    ang_w = 2.0 * np.pi * np.outer(n, k) / W                  # (W, Wf)
    Mr = np.zeros((W, 2 * Wf_pad), dtype=np.float64)
    Mr[:, :Wf] = np.cos(ang_w) / np.sqrt(W)
    Mr[:, Wf_pad:Wf_pad + Wf] = -np.sin(ang_w) / np.sqrt(W)

    # fft along H (ortho), embedded in an H_pad block (extra rows/cols zero).
    h = np.arange(H)
    ang_h = 2.0 * np.pi * np.outer(h, h) / H                  # (H, H)
    ch = np.zeros((H_pad, H_pad), dtype=np.float64)
    sh = np.zeros((H_pad, H_pad), dtype=np.float64)
    ch[:H, :H] = np.cos(ang_h) / np.sqrt(H)
    sh[:H, :H] = -np.sin(ang_h) / np.sqrt(H)
    # Block-diagonal over the Rt (batch, channel) pairs packed into rows.
    Fc = np.kron(np.eye(Rt), ch)                              # (Rt*H_pad, Rt*H_pad)
    Fs = np.kron(np.eye(Rt), sh)
    Fcs = np.concatenate([Fc, Fs], axis=0)                    # (2*Rt*H_pad, Rt*H_pad)

    # irfft along W (ortho): out = Zr @ A + Zi @ Bm (DC / Nyquist imag ignored,
    # matching numpy/PyTorch c2r semantics).
    A = np.zeros((Wf_pad, W), dtype=np.float64)
    Bm = np.zeros((Wf_pad, W), dtype=np.float64)
    A[0, :] = 1.0 / np.sqrt(W)
    for kk in range(1, Wf):
        c = np.cos(2.0 * np.pi * kk * n / W) / np.sqrt(W)
        s = np.sin(2.0 * np.pi * kk * n / W) / np.sqrt(W)
        if W % 2 == 0 and kk == W // 2:                        # Nyquist: imag ignored
            A[kk, :] = c
        else:
            A[kk, :] = 2.0 * c
            Bm[kk, :] = -2.0 * s
    Mi = np.concatenate([A, Bm], axis=0)                       # (2*Wf_pad, W)

    f32 = jnp.float32
    return jnp.asarray(Mr, f32), jnp.asarray(Fcs, f32), jnp.asarray(Mi, f32)


def _spectral_kernel(x_ref, w_ref, mr_ref, fcs_ref, mi_ref, o_ref):
    f32 = jnp.float32
    m = fcs_ref.shape[1]                      # Rt * H_pad (multiple of 8)
    wfp = w_ref.shape[-1]                     # Wf_pad (multiple of 128)

    x = x_ref[0]                              # (M, W)
    wr = w_ref[0, 0]                          # (M, Wf_pad)
    wi = w_ref[0, 1]                          # (M, Wf_pad)

    mr = mr_ref[...]                          # (W, 2*Wf_pad)
    fcs = fcs_ref[...]                        # (2*M, M)  -> [Fc ; Fs]
    mi = mi_ref[...]                          # (2*Wf_pad, W)

    # rfft along W (ortho): one matmul -> [X1r | X1i] lane-concatenated at a
    # vreg boundary (padded lanes are zero).
    x1 = jnp.dot(x, mr, preferred_element_type=f32)            # (M, 2*Wf_pad)

    # fft along H (ortho): one stacked matmul; split on sublane axis at M
    # (multiple of 8 -> free view).
    pq = jnp.dot(fcs, x1, preferred_element_type=f32)          # (2*M, 2*Wf_pad)
    p = pq[:m]                                                 # [Fc@X1r | Fc@X1i]
    q = pq[m:]                                                 # [Fs@X1r | Fs@X1i]
    x2r = p[:, :wfp] - q[:, wfp:]
    x2i = p[:, wfp:] + q[:, :wfp]

    # complex weight multiply (per channel/row, per spectral bin).
    yr = x2r * wr - x2i * wi
    yi = x2r * wi + x2i * wr
    ycat = jnp.concatenate([yr, yi], axis=1)                   # (M, 2*Wf_pad)

    # ifft along H (ortho): reuse [Fc ; Fs] (ifft cos == ch, ifft sin == -sh).
    pq2 = jnp.dot(fcs, ycat, preferred_element_type=f32)       # (2*M, 2*Wf_pad)
    p2 = pq2[:m]
    q2 = pq2[m:]
    zr = p2[:, :wfp] + q2[:, wfp:]
    zi = p2[:, wfp:] - q2[:, :wfp]
    zcat = jnp.concatenate([zr, zi], axis=1)                   # (M, 2*Wf_pad)

    # irfft along W (ortho): single matmul with stacked [A ; Bm].
    o_ref[0] = jnp.dot(zcat, mi, preferred_element_type=f32)   # (M, W)


def _pick_row_tile(n_pairs, h_pad, row_cap, min_steps):
    """Largest divisor Rt of n_pairs with Rt*H_pad <= row_cap and at least
    `min_steps` grid steps (when n_pairs permits)."""
    limit = max(1, row_cap // h_pad)
    limit = min(limit, max(1, n_pairs // max(1, min_steps)))
    for d in range(min(n_pairs, limit), 0, -1):
        if n_pairs % d == 0:
            return d
    return 1


def quzaosheng_forward(x, complex_weight, *, row_cap=256, min_grid_steps=1):
    """x: (B, C, H, W); complex_weight: (C, H, W//2+1, 2) float32.

    row_cap:        target rows (Rt*H_pad) per grid step; 256 fills the v6e/v7x
                    MXU (v5e simply takes two M passes).
    min_grid_steps: set to 2 on v7x so both TensorCores get a parallel grid
                    step when B*C permits; 1 minimizes per-step overhead on
                    single-TC chips (v5e/v6e).
    """
    B, C, H, W = x.shape
    Wf = W // 2 + 1
    assert complex_weight.shape == (C, H, Wf, 2)

    H_pad = ((H + 7) // 8) * 8                 # sublane-align the per-pair block
    Wf_pad = ((Wf + 127) // 128) * 128         # lane-align the real/imag halves

    n_pairs = B * C
    Rt = _pick_row_tile(n_pairs, H_pad, row_cap, min_grid_steps)
    G = n_pairs // Rt
    M = Rt * H_pad

    Mr, Fcs, Mi = _dft_matrices(H, H_pad, W, Wf_pad, Rt)

    # Fold (B, C, H_pad) into the matmul row dimension: (G, Rt*H_pad, W) slabs.
    xf = x.astype(jnp.float32)
    if H_pad != H:
        xf = jnp.pad(xf, ((0, 0), (0, 0), (0, H_pad - H), (0, 0)))
    x_slab = xf.reshape(G, M, W)

    # Pack the complex weight once: pad to (H_pad, Wf_pad), tile over batch
    # (pair order r = b*C + c matches the x reshape), stack real/imag.
    # TODO(synk): for very large B, tiling duplicates the weight B times in
    # HBM; flip min_grid_steps / keep batch on the grid in that regime.
    wf32 = complex_weight.astype(jnp.float32)
    wr = jnp.pad(wf32[..., 0], ((0, 0), (0, H_pad - H), (0, Wf_pad - Wf)))
    wi = jnp.pad(wf32[..., 1], ((0, 0), (0, H_pad - H), (0, Wf_pad - Wf)))
    wr = jnp.tile(wr, (B, 1, 1)).reshape(G, M, Wf_pad)
    wi = jnp.tile(wi, (B, 1, 1)).reshape(G, M, Wf_pad)
    w_packed = jnp.stack([wr, wi], axis=1)                     # (G, 2, M, Wf_pad)

    def const(shape):
        return pl.BlockSpec(shape, lambda g, _n=len(shape): (0,) * _n)

    out = pl.pallas_call(
        _spectral_kernel,
        out_shape=jax.ShapeDtypeStruct((G, M, W), jnp.float32),
        grid_spec=pltpu.PrefetchScalarGridSpec(
            num_scalar_prefetch=0,
            grid=(G,),
            in_specs=[
                pl.BlockSpec((1, M, W), lambda g: (g, 0, 0)),            # x slab
                pl.BlockSpec((1, 2, M, Wf_pad), lambda g: (g, 0, 0, 0)),  # weight
                const((W, 2 * Wf_pad)),        # rfft_W matrix  [cwt | swt]
                const((2 * M, M)),             # stacked [Fc ; Fs] block-diag
                const((2 * Wf_pad, W)),        # irfft_W matrix [A ; Bm]
            ],
            out_specs=pl.BlockSpec((1, M, W), lambda g: (g, 0, 0)),
        ),
        compiler_params=pltpu.CompilerParams(
            dimension_semantics=("parallel",)),
    )(x_slab, w_packed, Mr, Fcs, Mi)

    out = out.reshape(B, C, H_pad, W)
    if H_pad != H:
        out = out[:, :, :H, :]
    return out


if __name__ == "__main__":
    # Small shapes consistent with the module: dim=C, h=H, w=W//2+1.
    B, C, H, W = 2, 4, 16, 16
    Wf = W // 2 + 1

    key = jax.random.PRNGKey(0)
    kx, kw = jax.random.split(key)
    x = jax.random.normal(kx, (B, C, H, W), dtype=jnp.float32)
    # Deterministic stand-in for nn.Parameter(torch.randn(dim, h, w, 2) * 0.02)
    complex_weight = jax.random.normal(kw, (C, H, Wf, 2), dtype=jnp.float32) * 0.02

    out = jax.block_until_ready(quzaosheng_forward(x, complex_weight))

    # Pure-numpy reference of the PyTorch forward semantics.
    xn = np.asarray(x)
    wc = np.asarray(complex_weight)
    w_complex = wc[..., 0] + 1j * wc[..., 1]
    xf = np.fft.rfft2(xn, axes=(2, 3), norm="ortho")
    xf = xf * w_complex[None]
    ref = np.fft.irfft2(xf, s=(H, W), axes=(2, 3), norm="ortho")

    assert out.shape == (B, C, H, W)
    err = float(np.max(np.abs(np.asarray(out) - ref)))
    assert err < 1e-4, f"max abs error too large: {err}"
    print("KERNEL_OK")
</pallas_src>

<mosaic_0001>
module attributes {stable_mosaic.version = 11 : i64} {
  func.func @_spectral_kernel(%arg0: i32, %arg1: memref<1x128x16xf32, #tpu.memory_space<vmem>>, %arg2: memref<1x2x128x128xf32, #tpu.memory_space<vmem>>, %arg3: memref<16x256xf32, #tpu.memory_space<vmem>>, %arg4: memref<256x128xf32, #tpu.memory_space<vmem>>, %arg5: memref<256x16xf32, #tpu.memory_space<vmem>>, %arg6: memref<1x128x16xf32, #tpu.memory_space<vmem>>) attributes {dimension_semantics = [#tpu.dimension_semantics<parallel>], iteration_bounds = array<i64: 1>, scalar_prefetch = 0 : i64, scratch_operands = 0 : i64, tpu.core_type = #tpu.core_type<tc>, window_params = [{transform_indices = @transform_0, window_bounds = array<i64: 1, 128, 16>}, {transform_indices = @transform_1, window_bounds = array<i64: 1, 2, 128, 128>}, {pipeline_mode = #tpu.pipeline_mode<synchronous>, transform_indices = @transform_2, window_bounds = array<i64: 16, 256>}, {pipeline_mode = #tpu.pipeline_mode<synchronous>, transform_indices = @transform_3, window_bounds = array<i64: 256, 128>}, {pipeline_mode = #tpu.pipeline_mode<synchronous>, transform_indices = @transform_4, window_bounds = array<i64: 256, 16>}, {transform_indices = @transform_5, window_bounds = array<i64: 1, 128, 16>}]} {
    %c0 = arith.constant 0 : index
    %c0_0 = arith.constant 0 : index
    %c0_1 = arith.constant 0 : index
    %0 = vector.load %arg1[%c0, %c0_0, %c0_1] : memref<1x128x16xf32, #tpu.memory_space<vmem>>, vector<1x128x16xf32>
    %1 = vector.shape_cast %0 : vector<1x128x16xf32> to vector<128x16xf32>
    %c0_2 = arith.constant 0 : index
    %c0_3 = arith.constant 0 : index
    %c0_4 = arith.constant 0 : index
    %c0_5 = arith.constant 0 : index
    %2 = vector.load %arg2[%c0_2, %c0_3, %c0_4, %c0_5] : memref<1x2x128x128xf32, #tpu.memory_space<vmem>>, vector<1x1x128x128xf32>
    %3 = vector.shape_cast %2 : vector<1x1x128x128xf32> to vector<128x128xf32>
    %c0_6 = arith.constant 0 : index
    %c1 = arith.constant 1 : index
    %c0_7 = arith.constant 0 : index
    %c0_8 = arith.constant 0 : index
    %4 = vector.load %arg2[%c0_6, %c1, %c0_7, %c0_8] : memref<1x2x128x128xf32, #tpu.memory_space<vmem>>, vector<1x1x128x128xf32>
    %5 = vector.shape_cast %4 : vector<1x1x128x128xf32> to vector<128x128xf32>
    %c0_9 = arith.constant 0 : index
    %c0_10 = arith.constant 0 : index
    %6 = vector.load %arg3[%c0_9, %c0_10] : memref<16x256xf32, #tpu.memory_space<vmem>>, vector<16x256xf32>
    %c0_11 = arith.constant 0 : index
    %c0_12 = arith.constant 0 : index
    %7 = vector.load %arg4[%c0_11, %c0_12] : memref<256x128xf32, #tpu.memory_space<vmem>>, vector<256x128xf32>
    %c0_13 = arith.constant 0 : index
    %c0_14 = arith.constant 0 : index
    %8 = vector.load %arg5[%c0_13, %c0_14] : memref<256x16xf32, #tpu.memory_space<vmem>>, vector<256x16xf32>
    %cst = arith.constant dense<0.000000e+00> : vector<128x256xf32>
    %9 = tpu.matmul %1, %6, %cst {dimension_numbers = #tpu.dot_dimension_numbers<[1], [0], [0], [1], [0, 0, 1, 1], [], []>} : vector<128x16xf32>, vector<16x256xf32>, vector<128x256xf32> -> vector<128x256xf32>
    %cst_15 = arith.constant dense<0.000000e+00> : vector<256x256xf32>
    %10 = tpu.matmul %7, %9, %cst_15 {dimension_numbers = #tpu.dot_dimension_numbers<[1], [0], [0], [1], [0, 0, 1, 1], [], []>} : vector<256x128xf32>, vector<128x256xf32>, vector<256x256xf32> -> vector<256x256xf32>
    %11 = vector.extract_strided_slice %10 {offsets = [0, 0], sizes = [128, 256], strides = [1, 1]} : vector<256x256xf32> to vector<128x256xf32>
    %12 = vector.extract_strided_slice %10 {offsets = [128, 0], sizes = [128, 256], strides = [1, 1]} : vector<256x256xf32> to vector<128x256xf32>
    %13 = vector.extract_strided_slice %11 {offsets = [0, 0], sizes = [128, 128], strides = [1, 1]} : vector<128x256xf32> to vector<128x128xf32>
    %14 = vector.extract_strided_slice %12 {offsets = [0, 128], sizes = [128, 128], strides = [1, 1]} : vector<128x256xf32> to vector<128x128xf32>
    %15 = arith.subf %13, %14 : vector<128x128xf32>
    %16 = vector.extract_strided_slice %11 {offsets = [0, 128], sizes = [128, 128], strides = [1, 1]} : vector<128x256xf32> to vector<128x128xf32>
    %17 = vector.extract_strided_slice %12 {offsets = [0, 0], sizes = [128, 128], strides = [1, 1]} : vector<128x256xf32> to vector<128x128xf32>
    %18 = arith.addf %16, %17 : vector<128x128xf32>
    %19 = arith.mulf %15, %3 : vector<128x128xf32>
    %20 = arith.mulf %18, %5 : vector<128x128xf32>
    %21 = arith.subf %19, %20 : vector<128x128xf32>
    %22 = arith.mulf %15, %5 : vector<128x128xf32>
    %23 = arith.mulf %18, %3 : vector<128x128xf32>
    %24 = arith.addf %22, %23 : vector<128x128xf32>
    %25 = tpu.concatenate %21, %24 in 1 : vector<128x128xf32>, vector<128x128xf32> -> vector<128x256xf32>
    %cst_16 = arith.constant dense<0.000000e+00> : vector<256x256xf32>
    %26 = tpu.matmul %7, %25, %cst_16 {dimension_numbers = #tpu.dot_dimension_numbers<[1], [0], [0], [1], [0, 0, 1, 1], [], []>} : vector<256x128xf32>, vector<128x256xf32>, vector<256x256xf32> -> vector<256x256xf32>
    %27 = vector.extract_strided_slice %26 {offsets = [0, 0], sizes = [128, 256], strides = [1, 1]} : vector<256x256xf32> to vector<128x256xf32>
    %28 = vector.extract_strided_slice %26 {offsets = [128, 0], sizes = [128, 256], strides = [1, 1]} : vector<256x256xf32> to vector<128x256xf32>
    %29 = vector.extract_strided_slice %27 {offsets = [0, 0], sizes = [128, 128], strides = [1, 1]} : vector<128x256xf32> to vector<128x128xf32>
    %30 = vector.extract_strided_slice %28 {offsets = [0, 128], sizes = [128, 128], strides = [1, 1]} : vector<128x256xf32> to vector<128x128xf32>
    %31 = arith.addf %29, %30 : vector<128x128xf32>
    %32 = vector.extract_strided_slice %27 {offsets = [0, 128], sizes = [128, 128], strides = [1, 1]} : vector<128x256xf32> to vector<128x128xf32>
    %33 = vector.extract_strided_slice %28 {offsets = [0, 0], sizes = [128, 128], strides = [1, 1]} : vector<128x256xf32> to vector<128x128xf32>
    %34 = arith.subf %32, %33 : vector<128x128xf32>
    %35 = tpu.concatenate %31, %34 in 1 : vector<128x128xf32>, vector<128x128xf32> -> vector<128x256xf32>
    %cst_17 = arith.constant dense<0.000000e+00> : vector<128x16xf32>
    %36 = tpu.matmul %35, %8, %cst_17 {dimension_numbers = #tpu.dot_dimension_numbers<[1], [0], [0], [1], [0, 0, 1, 1], [], []>} : vector<128x256xf32>, vector<256x16xf32>, vector<128x16xf32> -> vector<128x16xf32>
    %c0_18 = arith.constant 0 : index
    %c0_19 = arith.constant 0 : index
    %c0_20 = arith.constant 0 : index
    %37 = vector.load %arg6[%c0_18, %c0_19, %c0_20] : memref<1x128x16xf32, #tpu.memory_space<vmem>>, vector<1x128x16xf32>
    %38 = vector.shape_cast %37 : vector<1x128x16xf32> to vector<128x16xf32>
    %39 = vector.shape_cast %36 : vector<128x16xf32> to vector<1x128x16xf32>
    tpu.vector_store %arg6[%c0_18, %c0_19, %c0_20], %39 {strides = array<i32>} : memref<1x128x16xf32, #tpu.memory_space<vmem>>, vector<1x128x16xf32>,
    return
  }
  func.func @transform_0(%arg0: i32) -> (i32, i32, i32) {
    %c0_i32 = arith.constant 0 : i32
    %c0_i32_0 = arith.constant 0 : i32
    %c0_i32_1 = arith.constant 0 : i32
    return %arg0, %c0_i32, %c0_i32_0 : i32, i32, i32
  }
  func.func @transform_1(%arg0: i32) -> (i32, i32, i32, i32) {
    %c0_i32 = arith.constant 0 : i32
    %c0_i32_0 = arith.constant 0 : i32
    %c0_i32_1 = arith.constant 0 : i32
    %c0_i32_2 = arith.constant 0 : i32
    return %arg0, %c0_i32, %c0_i32_0, %c0_i32_1 : i32, i32, i32, i32
  }
  func.func @transform_2(%arg0: i32) -> (i32, i32) {
    %c0_i32 = arith.constant 0 : i32
    %c0_i32_0 = arith.constant 0 : i32
    %c0_i32_1 = arith.constant 0 : i32
    return %c0_i32, %c0_i32_0 : i32, i32
  }
  func.func @transform_3(%arg0: i32) -> (i32, i32) {
    %c0_i32 = arith.constant 0 : i32
    %c0_i32_0 = arith.constant 0 : i32
    %c0_i32_1 = arith.constant 0 : i32
    return %c0_i32, %c0_i32_0 : i32, i32
  }
  func.func @transform_4(%arg0: i32) -> (i32, i32) {
    %c0_i32 = arith.constant 0 : i32
    %c0_i32_0 = arith.constant 0 : i32
    %c0_i32_1 = arith.constant 0 : i32
    return %c0_i32, %c0_i32_0 : i32, i32
  }
  func.func @transform_5(%arg0: i32) -> (i32, i32, i32) {
    %c0_i32 = arith.constant 0 : i32
    %c0_i32_0 = arith.constant 0 : i32
    %c0_i32_1 = arith.constant 0 : i32
    return %arg0, %c0_i32, %c0_i32_0 : i32, i32, i32
  }
}

</mosaic_0001>

<bundles_post_ra>
// kernel: tpu_custom_call.1
= control target key start
LH: loop header
LB: loop body
LE: loop exit
PB: predicated region body
PF: predicated region fallthrough
CT: control target
= control target key end

     0   :  { %10 = vsyncpa [#allocation3], 0  ;;  %s1204_s21 = smov [#allocation2]   ;;  %s1205_s23 = smov 128   ;;  %s2038_s0 = inlined_call_operand.vmem [shape: f32[1,128,16], index: 0, kind: input, shape index: {}]   ;;  %s2039_s1 = inlined_call_operand.vmem [shape: f32[1,2,128,128], index: 1, kind: input, shape index: {}]   ;;  %s2040_s2 = inlined_call_operand.vmem [shape: f32[16,256], index: 2, kind: input, shape index: {}]   ;;  %s2041_s3 = inlined_call_operand.hbm [shape: f32[256,128], index: 3, kind: input, shape index: {}]   ;;  %s2042_s4 = inlined_call_operand.vmem [shape: f32[256,16], index: 4, kind: input, shape index: {}]   ;;  %s2043_s5 = inlined_call_operand.vmem [shape: f32[1,128,16], index: 5, kind: output, shape index: {}]  }
   0x1   :  { %s21_s20 = sshll.u32 %s2041_s3, 4  ;;  %s23_s22 = sshll.u32 %s1204_s21, 4  ;;  %s22_s20 = int_to_ptr.hbm [resolvable:$true] %s21_s20  ;;  %s24_s22 = int_to_ptr.vmem [resolvable:$true] %s23_s22 }
   0x2   :  { %s1206_s24 = smov 8  }
   0x3   :  { %29 = dma.hbm_to_vmem [thread:$0]  %s22_s20, 4096, %s24_s22, [#allocation3], %s1205_s23, %s1205_s23, %s1206_s24  }
   0x4   :  { %1202 = dma.done.wait [#allocation3], 4096  }
   0x5   :  { %1203 = vsyncadd [#allocation3], 4294963200  ;;  %v87_v0 = vld [vmem:[%s2040_s2 + $0x10] sm:$0xff]  ;;  %v88_v1 = vld [vmem:[%s2040_s2 + $0x18] sm:$0xff]  ;;  %vm153_vm0 = vcmask 130048  }
   0x6   :  { %v85_v2 = vld [vmem:[%s2040_s2] sm:$0xff]  ;;  %216 = vmatpush.msra.mxu0 %v87_v0  ;;  %281 = vmatpush.msra.mxu1 %v88_v1  ;;  %v86_v3 = vld [vmem:[%s2040_s2 + $0x8] sm:$0xff]  ;;  %v38_v6 = vld [vmem:[%s2038_s0 + $0x10] sm:$0xff] }
   0x7   :  { %v36_v4 = vld [vmem:[%s2038_s0] sm:$0xff]  ;;  %v37_v5 = vld [vmem:[%s2038_s0 + $0x8] sm:$0xff]  ;;  %v39_v7 = vld [vmem:[%s2038_s0 + $0x18] sm:$0xff] }
   0x8   :  { %217 = vmatpush.msra.mxu0 %v85_v2  ;;  %282 = vmatpush.msra.mxu1 %v86_v3  ;;  %v40_v8 = vld [vmem:[%s2038_s0 + $0x20] sm:$0xff]  ;;  %v41_v9 = vld [vmem:[%s2038_s0 + $0x28] sm:$0xff]  ;;  %v42_v10 = vld [vmem:[%s2038_s0 + $0x30] sm:$0xff] }
   0x9   :  { %1111 = vmatmul.msk.f32.vlgmr.msra.gmra.mxu0 %vm153_vm0, %v36_v4  ;;  %1127 = vmatmul.msk.f32.vlgmr.msra.gmra.mxu1 %vm153_vm0, %v36_v4  ;;  %v43_v11 = vld [vmem:[%s2038_s0 + $0x38] sm:$0xff]  ;;  %v44_v12 = vld [vmem:[%s2038_s0 + $0x40] sm:$0xff]  ;;  %v45_v13 = vld [vmem:[%s2038_s0 + $0x48] sm:$0xff] }
   0xa   :  { %v46_v14 = vld [vmem:[%s2038_s0 + $0x50] sm:$0xff]  ;;  %v47_v15 = vld [vmem:[%s2038_s0 + $0x58] sm:$0xff]  ;;  %v48_v16 = vld [vmem:[%s2038_s0 + $0x60] sm:$0xff] }
   0xb   :  { %v49_v17 = vld [vmem:[%s2038_s0 + $0x68] sm:$0xff]  ;;  %v50_v18 = vld [vmem:[%s2038_s0 + $0x70] sm:$0xff]  ;;  %v51_v19 = vld [vmem:[%s2038_s0 + $0x78] sm:$0xff] }
   0xc   :  { %v1332_v52 = vld [vmem:[#allocation2] sm:$0xff]  ;;  %v1336_v53 = vld [vmem:[#allocation2 + $0x8] sm:$0xff]  ;;  %v1340_v54 = vld [vmem:[#allocation2 + $0x10] sm:$0xff] }
   0xd   :  { %2110 = vst [vmem:[#allocation5_spill] sm:$0xff] %v1332_v52  ;;  %v1344_v55 = vld [vmem:[#allocation2 + $0x18] sm:$0xff]  ;;  %v1348_v56 = vld [vmem:[#allocation2 + $0x20] sm:$0xff]  ;;  %v1352_v57 = vld [vmem:[#allocation2 + $0x28] sm:$0xff] }
   0xe   :  { %2111 = vst [vmem:[#allocation6_spill] sm:$0xff] %v1336_v53  ;;  %v1356_v58 = vld [vmem:[#allocation2 + $0x30] sm:$0xff]  ;;  %v1360_v59 = vld [vmem:[#allocation2 + $0x38] sm:$0xff]  ;;  %v1364_v60 = vld [vmem:[#allocation2 + $0x40] sm:$0xff] }
   0xf   :  { %2112 = vst [vmem:[#allocation7_spill] sm:$0xff] %v1340_v54  ;;  %v1368_v61 = vld [vmem:[#allocation2 + $0x48] sm:$0xff]  ;;  %v1372_v62 = vld [vmem:[#allocation2 + $0x50] sm:$0xff]  ;;  %v1376_v63 = vld [vmem:[#allocation2 + $0x58] sm:$0xff] }
  0x10   :  { %2113 = vst [vmem:[#allocation8_spill] sm:$0xff] %v1344_v55  ;;  %v1380_v0 = vld [vmem:[#allocation2 + $0x60] sm:$0xff]  ;;  %v1384_v1 = vld [vmem:[#allocation2 + $0x68] sm:$0xff]  ;;  %v1388_v2 = vld [vmem:[#allocation2 + $0x70] sm:$0xff] }
  0x11   :  { %1112 = vmatmul.msk.f32.gmra.mxu0 %vm153_vm0, %v37_v5  ;;  %1128 = vmatmul.msk.f32.gmra.mxu1 %vm153_vm0, %v37_v5  ;;  %2114 = vst [vmem:[#allocation9_spill] sm:$0xff] %v1348_v56  ;;  %v1392_v3 = vld [vmem:[#allocation2 + $0x78] sm:$0xff]  ;;  %v1396_v4 = vld [vmem:[#allocation2 + $0x80] sm:$0xff] }
  0x12   :  { %2115 = vst [vmem:[#allocation10_spill] sm:$0xff] %v1352_v57 }
  0x13   :  { %2116 = vst [vmem:[#allocation11_spill] sm:$0xff] %v1356_v58 }
  0x14   :  { %2117 = vst [vmem:[#allocation12_spill] sm:$0xff] %v1360_v59 }
  0x15   :  { %2118 = vst [vmem:[#allocation13_spill] sm:$0xff] %v1364_v60 }
  0x16   :  { %2119 = vst [vmem:[#allocation14_spill] sm:$0xff] %v1368_v61 }
  0x17   :  { %2120 = vst [vmem:[#allocation15_spill] sm:$0xff] %v1372_v62 }
  0x18   :  { %2121 = vst [vmem:[#allocation16_spill] sm:$0xff] %v1376_v63 }
  0x19   :  { %1113 = vmatmul.msk.f32.gmra.mxu0 %vm153_vm0, %v38_v6  ;;  %1129 = vmatmul.msk.f32.gmra.mxu1 %vm153_vm0, %v38_v6  ;;  %2122 = vst [vmem:[#allocation17_spill] sm:$0xff] %v1380_v0 }
  0x1a   :  { %2123 = vst [vmem:[#allocation18_spill] sm:$0xff] %v1384_v1 }
  0x1b   :  { %2124 = vst [vmem:[#allocation19_spill] sm:$0xff] %v1388_v2 }
  0x1c   :  { %2125 = vst [vmem:[#allocation20_spill] sm:$0xff] %v1392_v3 }
  0x1d   :  { %2126 = vst [vmem:[#allocation21_spill] sm:$0xff] %v1396_v4 }
  0x21   :  { %1114 = vmatmul.msk.f32.gmra.mxu0 %vm153_vm0, %v39_v7  ;;  %1130 = vmatmul.msk.f32.gmra.mxu1 %vm153_vm0, %v39_v7  ;;  %v1404_v7 = vld [vmem:[#allocation2 + $0x88] sm:$0xff] }
  0x22   :  { %2128 = vst [vmem:[#allocation23_spill] sm:$0xff] %v1404_v7 }
  0x29   :  { %1115 = vmatmul.msk.f32.gmra.mxu0 %vm153_vm0, %v40_v8  ;;  %1131 = vmatmul.msk.f32.gmra.mxu1 %vm153_vm0, %v40_v8 }
  0x31   :  { %1116 = vmatmul.msk.f32.gmra.mxu0 %vm153_vm0, %v41_v9  ;;  %1132 = vmatmul.msk.f32.gmra.mxu1 %vm153_vm0, %v41_v9 }
  0x39   :  { %1117 = vmatmul.msk.f32.gmra.mxu0 %vm153_vm0, %v42_v10  ;;  %1133 = vmatmul.msk.f32.gmra.mxu1 %vm153_vm0, %v42_v10  ;;  %v1412_v10 = vld [vmem:[#allocation2 + $0x90] sm:$0xff] }
  0x3a   :  { %2130 = vst [vmem:[#allocation25_spill] sm:$0xff] %v1412_v10 }
  0x41   :  { %1118 = vmatmul.msk.f32.gmra.mxu0 %vm153_vm0, %v43_v11  ;;  %1134 = vmatmul.msk.f32.gmra.mxu1 %vm153_vm0, %v43_v11 }
  0x49   :  { %1119 = vmatmul.msk.f32.gmra.mxu0 %vm153_vm0, %v44_v12  ;;  %1135 = vmatmul.msk.f32.gmra.mxu1 %vm153_vm0, %v44_v12 }
  0x51   :  { %1120 = vmatmul.msk.f32.gmra.mxu0 %vm153_vm0, %v45_v13  ;;  %1136 = vmatmul.msk.f32.gmra.mxu1 %vm153_vm0, %v45_v13  ;;  %v1420_v13 = vld [vmem:[#allocation2 + $0x98] sm:$0xff] }
  0x52   :  { %2132 = vst [vmem:[#allocation27_spill] sm:$0xff] %v1420_v13 }
  0x59   :  { %1121 = vmatmul.msk.f32.gmra.mxu0 %vm153_vm0, %v46_v14  ;;  %1137 = vmatmul.msk.f32.gmra.mxu1 %vm153_vm0, %v46_v14 }
  0x61   :  { %1122 = vmatmul.msk.f32.gmra.mxu0 %vm153_vm0, %v47_v15  ;;  %1138 = vmatmul.msk.f32.gmra.mxu1 %vm153_vm0, %v47_v15 }
  0x69   :  { %1123 = vmatmul.msk.f32.gmra.mxu0 %vm153_vm0, %v48_v16  ;;  %1139 = vmatmul.msk.f32.gmra.mxu1 %vm153_vm0, %v48_v16  ;;  %v1428_v16 = vld [vmem:[#allocation2 + $0xa0] sm:$0xff] }
  0x6a   :  { %2133 = vst [vmem:[#allocation28_spill] sm:$0xff] %v1428_v16 }
  0x71   :  { %1124 = vmatmul.msk.f32.gmra.mxu0 %vm153_vm0, %v49_v17  ;;  %1140 = vmatmul.msk.f32.gmra.mxu1 %vm153_vm0, %v49_v17 }
  0x79   :  { %1125 = vmatmul.msk.f32.gmra.mxu0 %vm153_vm0, %v50_v18  ;;  %1141 = vmatmul.msk.f32.gmra.mxu1 %vm153_vm0, %v50_v18 }
  0x81   :  { %1126 = vmatmul.msk.f32.gmra.mxu0 %vm153_vm0, %v51_v19  ;;  %1142 = vmatmul.msk.f32.gmra.mxu1 %vm153_vm0, %v51_v19  ;;  %v1436_v19 = vld [vmem:[#allocation2 + $0xa8] sm:$0xff] }
  0x82   :  { %2134 = vst [vmem:[#allocation29_spill] sm:$0xff] %v1436_v19 }
  0x86   :  { %v219_v20 = vpop.f32.mrf.mxu0  ;;  %v284_v21 = vpop.f32.mrf.mxu1 }
  0x8e   :  { %v222_v22 = vpop.f32.mrf.mxu0  ;;  %v287_v23 = vpop.f32.mrf.mxu1 }
  0x96   :  { %v225_v24 = vpop.f32.mrf.mxu0  ;;  %v290_v25 = vpop.f32.mrf.mxu1 }
  0x9e   :  { %v228_v26 = vpop.f32.mrf.mxu0  ;;  %v293_v27 = vpop.f32.mrf.mxu1 }
  0xa6   :  { %v231_v28 = vpop.f32.mrf.mxu0  ;;  %v296_v29 = vpop.f32.mrf.mxu1 }
  0xae   :  { %v234_v30 = vpop.f32.mrf.mxu0  ;;  %v299_v31 = vpop.f32.mrf.mxu1 }
  0xb6   :  { %v237_v32 = vpop.f32.mrf.mxu0  ;;  %v302_v33 = vpop.f32.mrf.mxu1 }
  0xbe   :  { %v240_v34 = vpop.f32.mrf.mxu0  ;;  %v305_v35 = vpop.f32.mrf.mxu1 }
  0xc6   :  { %v243_v36 = vpop.f32.mrf.mxu0  ;;  %v308_v37 = vpop.f32.mrf.mxu1 }
  0xce   :  { %v246_v38 = vpop.f32.mrf.mxu0  ;;  %v311_v39 = vpop.f32.mrf.mxu1 }
  0xd6   :  { %v249_v40 = vpop.f32.mrf.mxu0  ;;  %v314_v41 = vpop.f32.mrf.mxu1 }
  0xde   :  { %v252_v42 = vpop.f32.mrf.mxu0  ;;  %v317_v43 = vpop.f32.mrf.mxu1 }
  0xe6   :  { %v255_v44 = vpop.f32.mrf.mxu0  ;;  %v320_v45 = vpop.f32.mrf.mxu1 }
  0xee   :  { %v258_v46 = vpop.f32.mrf.mxu0  ;;  %v323_v47 = vpop.f32.mrf.mxu1 }
  0xf6   :  { %v261_v48 = vpop.f32.mrf.mxu0  ;;  %v326_v49 = vpop.f32.mrf.mxu1 }
  0xfe   :  { %v264_v50 = vpop.f32.mrf.mxu0  ;;  %v329_v51 = vpop.f32.mrf.mxu1 }
  0xff   :  { %332 = vmatpush.msra.mxu2 %v264_v50  ;;  %445 = vmatpush.msra.mxu3 %v329_v51 }
 0x101   :  { %333 = vmatpush.msra.mxu2 %v261_v48  ;;  %446 = vmatpush.msra.mxu3 %v326_v49  ;;  %v1508_v49 = vld [vmem:[#allocation2 + $0xf8] sm:$0xff] }
 0x102   :  { %2144 = vst [vmem:[#allocation39_spill] sm:$0xff] %v1508_v49 }
 0x103   :  { %334 = vmatpush.msra.mxu2 %v258_v46  ;;  %447 = vmatpush.msra.mxu3 %v323_v47  ;;  %v1504_v46 = vld [vmem:[#allocation2 + $0xf0] sm:$0xff] }
 0x104   :  { %2143 = vst [vmem:[#allocation38_spill] sm:$0xff] %v1504_v46 }
 0x105   :  { %335 = vmatpush.msra.mxu2 %v255_v44  ;;  %448 = vmatpush.msra.mxu3 %v320_v45 }
 0x107   :  { %336 = vmatpush.msra.mxu2 %v252_v42  ;;  %449 = vmatpush.msra.mxu3 %v317_v43  ;;  %v1496_v43 = vld [vmem:[#allocation2 + $0xe8] sm:$0xff] }
 0x108   :  { %2142 = vst [vmem:[#allocation37_spill] sm:$0xff] %v1496_v43 }
 0x109   :  { %337 = vmatpush.msra.mxu2 %v249_v40  ;;  %450 = vmatpush.msra.mxu3 %v314_v41  ;;  %v1488_v40 = vld [vmem:[#allocation2 + $0xe0] sm:$0xff] }
 0x10a   :  { %2141 = vst [vmem:[#allocation36_spill] sm:$0xff] %v1488_v40 }
 0x10b   :  { %338 = vmatpush.msra.mxu2 %v246_v38  ;;  %451 = vmatpush.msra.mxu3 %v311_v39 }
 0x10d   :  { %339 = vmatpush.msra.mxu2 %v243_v36  ;;  %452 = vmatpush.msra.mxu3 %v308_v37  ;;  %v1480_v37 = vld [vmem:[#allocation2 + $0xd8] sm:$0xff] }
 0x10e   :  { %2140 = vst [vmem:[#allocation35_spill] sm:$0xff] %v1480_v37 }
 0x10f   :  { %340 = vmatpush.msra.mxu2 %v240_v34  ;;  %453 = vmatpush.msra.mxu3 %v305_v35  ;;  %v1472_v34 = vld [vmem:[#allocation2 + $0xd0] sm:$0xff] }
 0x110   :  { %2139 = vst [vmem:[#allocation34_spill] sm:$0xff] %v1472_v34 }
 0x111   :  { %341 = vmatpush.msra.mxu2 %v237_v32  ;;  %454 = vmatpush.msra.mxu3 %v302_v33 }
 0x113   :  { %342 = vmatpush.msra.mxu2 %v234_v30  ;;  %455 = vmatpush.msra.mxu3 %v299_v31  ;;  %v1464_v31 = vld [vmem:[#allocation2 + $0xc8] sm:$0xff] }
 0x114   :  { %2138 = vst [vmem:[#allocation33_spill] sm:$0xff] %v1464_v31 }
 0x115   :  { %343 = vmatpush.msra.mxu2 %v231_v28  ;;  %456 = vmatpush.msra.mxu3 %v296_v29  ;;  %v1456_v28 = vld [vmem:[#allocation2 + $0xc0] sm:$0xff] }
 0x116   :  { %2137 = vst [vmem:[#allocation32_spill] sm:$0xff] %v1456_v28 }
 0x117   :  { %344 = vmatpush.msra.mxu2 %v228_v26  ;;  %457 = vmatpush.msra.mxu3 %v293_v27 }
 0x119   :  { %345 = vmatpush.msra.mxu2 %v225_v24  ;;  %458 = vmatpush.msra.mxu3 %v290_v25  ;;  %v1452_v25 = vld [vmem:[#allocation2 + $0xb8] sm:$0xff] }
 0x11a   :  { %2136 = vst [vmem:[#allocation31_spill] sm:$0xff] %v1452_v25 }
 0x11b   :  { %346 = vmatpush.msra.mxu2 %v222_v22  ;;  %459 = vmatpush.msra.mxu3 %v287_v23  ;;  %v1444_v22 = vld [vmem:[#allocation2 + $0xb0] sm:$0xff] }
 0x11c   :  { %2135 = vst [vmem:[#allocation30_spill] sm:$0xff] %v1444_v22 }
 0x11d   :  { %347 = vmatpush.msra.mxu2 %v219_v20  ;;  %460 = vmatpush.msra.mxu3 %v284_v21 }
 0x11e   :  { %348 = vmatmul.f32.vlgmr.msra.gmra.mxu2 %v1332_v52  ;;  %461 = vmatmul.f32.vlgmr.msra.gmra.mxu3 %v1332_v52 }
 0x126   :  { %351 = vmatmul.f32.gmra.mxu2 %v1336_v53  ;;  %464 = vmatmul.f32.gmra.mxu3 %v1336_v53 }
 0x12e   :  { %354 = vmatmul.f32.gmra.mxu2 %v1340_v54  ;;  %467 = vmatmul.f32.gmra.mxu3 %v1340_v54 }
 0x136   :  { %357 = vmatmul.f32.gmra.mxu2 %v1344_v55  ;;  %470 = vmatmul.f32.gmra.mxu3 %v1344_v55 }
 0x13e   :  { %360 = vmatmul.f32.gmra.mxu2 %v1348_v56  ;;  %473 = vmatmul.f32.gmra.mxu3 %v1348_v56 }
 0x146   :  { %363 = vmatmul.f32.gmra.mxu2 %v1352_v57  ;;  %476 = vmatmul.f32.gmra.mxu3 %v1352_v57  ;;  %v60_v57 = vld [vmem:[%s2039_s1 + $0x40] sm:$0xff] }
 0x14e   :  { %366 = vmatmul.f32.gmra.mxu2 %v1356_v58  ;;  %479 = vmatmul.f32.gmra.mxu3 %v1356_v58 }
 0x156   :  { %369 = vmatmul.f32.gmra.mxu2 %v1360_v59  ;;  %482 = vmatmul.f32.gmra.mxu3 %v1360_v59 }
 0x15e   :  { %372 = vmatmul.f32.gmra.mxu2 %v1364_v60  ;;  %485 = vmatmul.f32.gmra.mxu3 %v1364_v60 }
 0x166   :  { %375 = vmatmul.f32.gmra.mxu2 %v1368_v61  ;;  %488 = vmatmul.f32.gmra.mxu3 %v1368_v61 }
 0x16e   :  { %378 = vmatmul.f32.gmra.mxu2 %v1372_v62  ;;  %491 = vmatmul.f32.gmra.mxu3 %v1372_v62 }
 0x176   :  { %381 = vmatmul.f32.gmra.mxu2 %v1376_v63  ;;  %494 = vmatmul.f32.gmra.mxu3 %v1376_v63 }
 0x17e   :  { %384 = vmatmul.f32.gmra.mxu2 %v1380_v0  ;;  %497 = vmatmul.f32.gmra.mxu3 %v1380_v0 }
 0x186   :  { %387 = vmatmul.f32.gmra.mxu2 %v1384_v1  ;;  %500 = vmatmul.f32.gmra.mxu3 %v1384_v1 }
 0x18e   :  { %390 = vmatmul.f32.gmra.mxu2 %v1388_v2  ;;  %503 = vmatmul.f32.gmra.mxu3 %v1388_v2 }
 0x196   :  { %393 = vmatmul.f32.gmra.mxu2 %v1392_v3  ;;  %506 = vmatmul.f32.gmra.mxu3 %v1392_v3 }
 0x19e   :  { %396 = vmatmul.f32.gmra.mxu2 %v1396_v4  ;;  %509 = vmatmul.f32.gmra.mxu3 %v1396_v4  ;;  %v1102_v4 = vld [vmem:[%s2039_s1 + $0xb8] sm:$0xff] }
 0x1a1   :  { %v1400_v5 = vpop.f32.mrf.mxu2  ;;  %v1402_v6 = vpop.f32.mrf.mxu3 }
 0x1a2   :  { %2127 = vst [vmem:[#allocation22_spill] sm:$0xff] %v1400_v5 }
 0x1a6   :  { %399 = vmatmul.f32.gmra.mxu2 %v1404_v7  ;;  %512 = vmatmul.f32.gmra.mxu3 %v1404_v7  ;;  %v59_v7 = vld [vmem:[%s2039_s1 + $0x38] sm:$0xff] }
 0x1a9   :  { %v1408_v8 = vpop.f32.mrf.mxu2  ;;  %v1410_v9 = vpop.f32.mrf.mxu3 }
 0x1aa   :  { %2129 = vst [vmem:[#allocation24_spill] sm:$0xff] %v1408_v8 }
 0x1ae   :  { %402 = vmatmul.f32.gmra.mxu2 %v1412_v10  ;;  %515 = vmatmul.f32.gmra.mxu3 %v1412_v10 }
 0x1b1   :  { %v1416_v11 = vpop.f32.mrf.mxu2  ;;  %v1418_v12 = vpop.f32.mrf.mxu3 }
 0x1b2   :  { %2131 = vst [vmem:[#allocation26_spill] sm:$0xff] %v1416_v11 }
 0x1b6   :  { %405 = vmatmul.f32.gmra.mxu2 %v1420_v13  ;;  %518 = vmatmul.f32.gmra.mxu3 %v1420_v13 }
 0x1b9   :  { %v1424_v14 = vpop.f32.mrf.mxu2  ;;  %v1426_v15 = vpop.f32.mrf.mxu3 }
 0x1be   :  { %408 = vmatmul.f32.gmra.mxu2 %v1428_v16  ;;  %521 = vmatmul.f32.gmra.mxu3 %v1428_v16 }
 0x1c1   :  { %v1432_v17 = vpop.f32.mrf.mxu2  ;;  %v1434_v18 = vpop.f32.mrf.mxu3 }
 0x1c6   :  { %411 = vmatmul.f32.gmra.mxu2 %v1436_v19  ;;  %524 = vmatmul.f32.gmra.mxu3 %v1436_v19 }
 0x1c9   :  { %v1440_v20 = vpop.f32.mrf.mxu2  ;;  %v1442_v21 = vpop.f32.mrf.mxu3 }
 0x1ce   :  { %414 = vmatmul.f32.gmra.mxu2 %v1444_v22  ;;  %527 = vmatmul.f32.gmra.mxu3 %v1444_v22 }
 0x1d1   :  { %v1448_v23 = vpop.f32.mrf.mxu2  ;;  %v1450_v24 = vpop.f32.mrf.mxu3 }
 0x1d6   :  { %417 = vmatmul.f32.gmra.mxu2 %v1452_v25  ;;  %530 = vmatmul.f32.gmra.mxu3 %v1452_v25 }
 0x1d9   :  { %v370_v26 = vpop.f32.mrf.mxu2  ;;  %v483_v27 = vpop.f32.mrf.mxu3 }
 0x1de   :  { %420 = vmatmul.f32.gmra.mxu2 %v1456_v28  ;;  %533 = vmatmul.f32.gmra.mxu3 %v1456_v28 }
 0x1e1   :  { %v1460_v29 = vpop.f32.mrf.mxu2  ;;  %v1462_v30 = vpop.f32.mrf.mxu3 }
 0x1e6   :  { %423 = vmatmul.f32.gmra.mxu2 %v1464_v31  ;;  %536 = vmatmul.f32.gmra.mxu3 %v1464_v31 }
 0x1e9   :  { %v1468_v32 = vpop.f32.mrf.mxu2  ;;  %v1470_v33 = vpop.f32.mrf.mxu3 }
 0x1ee   :  { %426 = vmatmul.f32.gmra.mxu2 %v1472_v34  ;;  %539 = vmatmul.f32.gmra.mxu3 %v1472_v34 }
 0x1f1   :  { %v1476_v35 = vpop.f32.mrf.mxu2  ;;  %v1478_v36 = vpop.f32.mrf.mxu3 }
 0x1f6   :  { %429 = vmatmul.f32.gmra.mxu2 %v1480_v37  ;;  %542 = vmatmul.f32.gmra.mxu3 %v1480_v37 }
 0x1f9   :  { %v1484_v38 = vpop.f32.mrf.mxu2  ;;  %v1486_v39 = vpop.f32.mrf.mxu3 }
 0x1fe   :  { %432 = vmatmul.f32.gmra.mxu2 %v1488_v40  ;;  %545 = vmatmul.f32.gmra.mxu3 %v1488_v40 }
 0x201   :  { %v1492_v41 = vpop.f32.mrf.mxu2  ;;  %v1494_v42 = vpop.f32.mrf.mxu3 }
 0x206   :  { %435 = vmatmul.f32.gmra.mxu2 %v1496_v43  ;;  %548 = vmatmul.f32.gmra.mxu3 %v1496_v43 }
 0x209   :  { %v1500_v44 = vpop.f32.mrf.mxu2  ;;  %v1502_v45 = vpop.f32.mrf.mxu3 }
 0x20e   :  { %438 = vmatmul.f32.gmra.mxu2 %v1504_v46  ;;  %551 = vmatmul.f32.gmra.mxu3 %v1504_v46 }
 0x211   :  { %v391_v47 = vpop.f32.mrf.mxu2  ;;  %v504_v48 = vpop.f32.mrf.mxu3 }
 0x216   :  { %441 = vmatmul.f32.gmra.mxu2 %v1508_v49  ;;  %554 = vmatmul.f32.gmra.mxu3 %v1508_v49 }
 0x219   :  { %v1512_v50 = vpop.f32.mrf.mxu2  ;;  %v1514_v51 = vpop.f32.mrf.mxu3 }
 0x221   :  { %v1516_v43 = vpop.f32.mrf.mxu2  ;;  %v1518_v40 = vpop.f32.mrf.mxu3 }
 0x222   :  { %2145 = vst [vmem:[#allocation40_spill] sm:$0xff] %v1518_v40 }
 0x229   :  { %v1520_v37 = vpop.f32.mrf.mxu2  ;;  %v1522_v34 = vpop.f32.mrf.mxu3 }
 0x22a   :  { %2146 = vst [vmem:[#allocation41_spill] sm:$0xff] %v1522_v34 }
 0x231   :  { %v1524_v46 = vpop.f32.mrf.mxu2  ;;  %v1526_v31 = vpop.f32.mrf.mxu3 }
 0x232   :  { %2147 = vst [vmem:[#allocation42_spill] sm:$0xff] %v1526_v31 }
 0x239   :  { %v1528_v28 = vpop.f32.mrf.mxu2  ;;  %v1530_v25 = vpop.f32.mrf.mxu3 }
 0x241   :  { %v1532_v49 = vpop.f32.mrf.mxu2  ;;  %v1534_v22 = vpop.f32.mrf.mxu3 }
 0x249   :  { %v1536_v19 = vpop.f32.mrf.mxu2  ;;  %v1538_v16 = vpop.f32.mrf.mxu3 }
 0x251   :  { %v1540_v13 = vpop.f32.mrf.mxu2  ;;  %v1542_v10 = vpop.f32.mrf.mxu3 }
 0x259   :  { %v418_v3 = vpop.f32.mrf.mxu2  ;;  %v531_v2 = vpop.f32.mrf.mxu3 }
 0x25a   :  { %v581_v1 = vadd.f32 %v483_v27, %v418_v3  ;;  %v565_v0 = vsub.f32 %v370_v26, %v531_v2  ;;  %v1103_v3 = vld [vmem:[%s2039_s1 + $0xc0] sm:$0xff] }
 0x25c   :  { %v1550_v63 = vmul.f32 %v1102_v4, %v581_v1  ;;  %v661_v62 = vmul.f32 %v581_v1, %v59_v7  ;;  %v1552_v61 = vmul.f32 %v565_v0, %v59_v7  ;;  %v645_v60 = vmul.f32 %v1102_v4, %v565_v0 }
 0x25e   :  { %2148 = vst [vmem:[#allocation43_spill] sm:$0xff] %v1550_v63  ;;  %v1556_v58 = vadd.f32 %v661_v62, %v645_v60 }
 0x25f   :  { %2149 = vst [vmem:[#allocation44_spill] sm:$0xff] %v1552_v61 }
 0x260   :  { %2150 = vst [vmem:[#allocation45_spill] sm:$0xff] %v1556_v58 }
 0x261   :  { %v421_v2 = vpop.f32.mrf.mxu2  ;;  %v534_v26 = vpop.f32.mrf.mxu3 }
 0x262   :  { %v582_v1 = vadd.f32 %v1462_v30, %v421_v2  ;;  %v566_v7 = vsub.f32 %v1460_v29, %v534_v26 }
 0x264   :  { %v1566_v0 = vmul.f32 %v1103_v3, %v582_v1  ;;  %v662_v4 = vmul.f32 %v582_v1, %v60_v57  ;;  %v1568_v27 = vmul.f32 %v566_v7, %v60_v57  ;;  %v646_v60 = vmul.f32 %v1103_v3, %v566_v7  ;;  %v66_v3 = vld [vmem:[%s2039_s1 + $0x70] sm:$0xff] }
 0x265   :  { %v1109_v7 = vld [vmem:[%s2039_s1 + $0xf0] sm:$0xff] }
 0x266   :  { %v1572_v59 = vadd.f32 %v662_v4, %v646_v60 }
 0x269   :  { %v424_v56 = vpop.f32.mrf.mxu2  ;;  %v537_v55 = vpop.f32.mrf.mxu3 }
 0x26a   :  { %v1581_v4 = vadd.f32 %v1470_v33, %v424_v56  ;;  %v1108_v56 = vld [vmem:[%s2039_s1 + $0xe8] sm:$0xff] }
 0x271   :  { %v427_v54 = vpop.f32.mrf.mxu2  ;;  %v540_v53 = vpop.f32.mrf.mxu3 }
 0x272   :  { %v584_v60 = vadd.f32 %v1478_v36, %v427_v54  ;;  %v65_v54 = vld [vmem:[%s2039_s1 + $0x68] sm:$0xff] }
 0x279   :  { %v430_v52 = vpop.f32.mrf.mxu2  ;;  %v543_v5 = vpop.f32.mrf.mxu3 }
 0x281   :  { %v433_v30 = vpop.f32.mrf.mxu2  ;;  %v546_v2 = vpop.f32.mrf.mxu3 }
 0x282   :  { %v586_v62 = vadd.f32 %v1494_v42, %v433_v30  ;;  %v570_v58 = vsub.f32 %v1492_v41, %v546_v2  ;;  %v64_v41 = vld [vmem:[%s2039_s1 + $0x60] sm:$0xff] }
 0x283   :  { %v1107_v2 = vld [vmem:[%s2039_s1 + $0xe0] sm:$0xff] }
 0x289   :  { %v436_v29 = vpop.f32.mrf.mxu2  ;;  %v549_v26 = vpop.f32.mrf.mxu3 }
 0x28a   :  { %v587_v34 = vadd.f32 %v1502_v45, %v436_v29  ;;  %v571_v33 = vsub.f32 %v1500_v44, %v549_v26 }
 0x28c   :  { %v619_v26 = vmul.f32 %v1108_v56, %v587_v34 }
 0x291   :  { %v439_v40 = vpop.f32.mrf.mxu2  ;;  %v552_v1 = vpop.f32.mrf.mxu3 }
 0x292   :  { %v588_v57 = vadd.f32 %v504_v48, %v439_v40  ;;  %v572_v8 = vsub.f32 %v391_v47, %v552_v1  ;;  %v67_v40 = vld [vmem:[%s2039_s1 + $0x78] sm:$0xff] }
 0x293   :  { %v1110_v47 = vld [vmem:[%s2039_s1 + $0xf8] sm:$0xff] }
 0x294   :  { %v620_v45 = vmul.f32 %v1109_v7, %v588_v57  ;;  %v668_v30 = vmul.f32 %v588_v57, %v66_v3  ;;  %v604_v29 = vmul.f32 %v572_v8, %v66_v3  ;;  %v652_v63 = vmul.f32 %v1109_v7, %v572_v8  ;;  %v63_v8 = vld [vmem:[%s2039_s1 + $0x58] sm:$0xff] }
 0x295   :  { %v667_v57 = vmul.f32 %v587_v34, %v65_v54  ;;  %v1106_v3 = vld [vmem:[%s2039_s1 + $0xd8] sm:$0xff]  ;;  %v603_v7 = vmul.f32 %v571_v33, %v65_v54  ;;  %v1105_v34 = vld [vmem:[%s2039_s1 + $0xd0] sm:$0xff] }
 0x296   :  { %v636_v54 = vsub.f32 %v604_v29, %v620_v45  ;;  %v616_v45 = vmul.f32 %v1105_v34, %v584_v60 }
 0x299   :  { %v442_v48 = vpop.f32.mrf.mxu2  ;;  %v555_v1 = vpop.f32.mrf.mxu3 }
 0x29a   :  { %v589_v36 = vadd.f32 %v1514_v51, %v442_v48  ;;  %v573_v42 = vsub.f32 %v1512_v50, %v555_v1  ;;  %v585_v51 = vadd.f32 %v1486_v39, %v430_v52  ;;  %v569_v50 = vsub.f32 %v1484_v38, %v543_v5  ;;  %v62_v5 = vld [vmem:[%s2039_s1 + $0x50] sm:$0xff] }
 0x29b   :  { %v651_v48 = vmul.f32 %v1108_v56, %v571_v33  ;;  %v666_v52 = vmul.f32 %v586_v62, %v64_v41  ;;  %v602_v39 = vmul.f32 %v570_v58, %v64_v41  ;;  %v650_v38 = vmul.f32 %v1107_v2, %v570_v58 }
 0x29c   :  { %v621_v61 = vmul.f32 %v1110_v47, %v589_v36  ;;  %v669_v11 = vmul.f32 %v589_v36, %v67_v40  ;;  %v605_v31 = vmul.f32 %v573_v42, %v67_v40  ;;  %v653_v44 = vmul.f32 %v1110_v47, %v573_v42 }
 0x29d   :  { %v568_v40 = vsub.f32 %v1476_v35, %v540_v53  ;;  %v618_v47 = vmul.f32 %v1107_v2, %v586_v62  ;;  %v684_v56 = vadd.f32 %v668_v30, %v652_v63  ;;  %v665_v53 = vmul.f32 %v585_v51, %v63_v8  ;;  %v61_v35 = vld [vmem:[%s2039_s1 + $0x48] sm:$0xff] }
 0x29e   :  { %v637_v1 = vsub.f32 %v605_v31, %v621_v61  ;;  %v685_v36 = vadd.f32 %v669_v11, %v653_v44  ;;  %v567_v61 = vsub.f32 %v1468_v32, %v537_v55  ;;  %v617_v11 = vmul.f32 %v1106_v3, %v585_v51  ;;  %v1104_v62 = vld [vmem:[%s2039_s1 + $0xc8] sm:$0xff] }
 0x29f   :  { %v601_v31 = vmul.f32 %v569_v50, %v63_v8  ;;  %v649_v33 = vmul.f32 %v1106_v3, %v569_v50  ;;  %v635_v58 = vsub.f32 %v603_v7, %v619_v26  ;;  %v683_v42 = vadd.f32 %v667_v57, %v651_v48 }
 0x2a0   :  { %686 = vmatpush.msrb.mxu0 %v637_v1  ;;  %799 = vmatpush.msrb.mxu1 %v685_v36  ;;  %v664_v63 = vmul.f32 %v584_v60, %v62_v5  ;;  %v600_v30 = vmul.f32 %v568_v40, %v62_v5  ;;  %v648_v55 = vmul.f32 %v1105_v34, %v568_v40  ;;  %v57_v1 = vld [vmem:[%s2039_s1 + $0x28] sm:$0xff] }
 0x2a1   :  { %v634_v32 = vsub.f32 %v602_v39, %v618_v47  ;;  %v682_v29 = vadd.f32 %v666_v52, %v650_v38  ;;  %v615_v41 = vmul.f32 %v1104_v62, %v1581_v4  ;;  %v663_v2 = vmul.f32 %v1581_v4, %v61_v35  ;;  %v58_v4 = vld [vmem:[%s2039_s1 + $0x30] sm:$0xff] }
 0x2a2   :  { %687 = vmatpush.msrb.mxu0 %v636_v54  ;;  %800 = vmatpush.msrb.mxu1 %v684_v56  ;;  %v599_v44 = vmul.f32 %v567_v61, %v61_v35  ;;  %v647_v51 = vmul.f32 %v1104_v62, %v567_v61  ;;  %v633_v50 = vsub.f32 %v601_v31, %v617_v11  ;;  %v2155_v38 = vld [vmem:[#allocation43_spill] sm:$0xff]  ;;  %v2157_v54 = vld [vmem:[#allocation45_spill] sm:$0xff]  ;;  %v2159_v62 = vld [vmem:[#allocation24_spill] sm:$0xff] }
 0x2a3   :  { %v681_v8 = vadd.f32 %v665_v53, %v649_v33  ;;  %v564_v26 = vsub.f32 %v1448_v23, %v1542_v10  ;;  %v580_v60 = vadd.f32 %v1450_v24, %v1540_v13  ;;  %v632_v57 = vsub.f32 %v600_v30, %v616_v45  ;;  %v1101_v10 = vld [vmem:[%s2039_s1 + $0xb0] sm:$0xff]  ;;  %v2158_v35 = vld [vmem:[#allocation41_spill] sm:$0xff] }
 0x2a4   :  { %688 = vmatpush.msrb.mxu0 %v635_v58  ;;  %801 = vmatpush.msrb.mxu1 %v683_v42  ;;  %v680_v3 = vadd.f32 %v664_v63, %v648_v55  ;;  %v1641_v7 = vadd.f32 %v1402_v6, %v1516_v43  ;;  %v563_v48 = vsub.f32 %v1440_v20, %v1538_v16  ;;  %v54_v53 = vld [vmem:[%s2039_s1 + $0x10] sm:$0xff] }
 0x2a5   :  { %v579_v13 = vadd.f32 %v1442_v21, %v1536_v19  ;;  %v631_v23 = vsub.f32 %v599_v44, %v615_v41  ;;  %v679_v24 = vadd.f32 %v663_v2, %v647_v51  ;;  %v1655_v6 = vadd.f32 %v1410_v9, %v1520_v37  ;;  %v1100_v19 = vld [vmem:[%s2039_s1 + $0xa8] sm:$0xff]  ;;  %v56_v9 = vld [vmem:[%s2039_s1 + $0x20] sm:$0xff]  ;;  %v1097_v31 = vld [vmem:[%s2039_s1 + $0x90] sm:$0xff] }
 0x2a6   :  { %689 = vmatpush.msrb.mxu0 %v634_v32  ;;  %802 = vmatpush.msrb.mxu1 %v682_v29  ;;  %v578_v16 = vadd.f32 %v1434_v18, %v1532_v49  ;;  %v562_v20 = vsub.f32 %v1432_v17, %v1534_v22  ;;  %v596_v43 = vmul.f32 %v564_v26, %v58_v4  ;;  %v1099_v18 = vld [vmem:[%s2039_s1 + $0xa0] sm:$0xff]  ;;  %v53_v32 = vld [vmem:[%s2039_s1 + $0x8] sm:$0xff]  ;;  %v2160_v41 = vld [vmem:[#allocation40_spill] sm:$0xff] }
 0x2a7   :  { %v612_v21 = vmul.f32 %v1101_v10, %v580_v60  ;;  %v644_v36 = vmul.f32 %v1101_v10, %v564_v26  ;;  %v660_v40 = vmul.f32 %v580_v60, %v58_v4  ;;  %v576_v17 = vadd.f32 %v1418_v12, %v1524_v46  ;;  %v55_v12 = vld [vmem:[%s2039_s1 + $0x18] sm:$0xff]  ;;  %v1096_v29 = vld [vmem:[%s2039_s1 + $0x88] sm:$0xff]  ;;  %v1095_v4 = vld [vmem:[%s2039_s1 + $0x80] sm:$0xff] }
 0x2a8   :  { %690 = vmatpush.msrb.mxu0 %v633_v50  ;;  %803 = vmatpush.msrb.mxu1 %v681_v8  ;;  %v577_v22 = vadd.f32 %v1426_v15, %v1528_v28  ;;  %v561_v37 = vsub.f32 %v1424_v14, %v1530_v25  ;;  %v595_v49 = vmul.f32 %v563_v48, %v57_v1  ;;  %v1098_v15 = vld [vmem:[%s2039_s1 + $0x98] sm:$0xff]  ;;  %v2152_v28 = vld [vmem:[#allocation42_spill] sm:$0xff] }
 0x2a9   :  { %v2151_v47 = vsub.f32 %v1568_v27, %v1566_v0  ;;  %v611_v52 = vmul.f32 %v1100_v19, %v579_v13  ;;  %v643_v39 = vmul.f32 %v1100_v19, %v563_v48  ;;  %v659_v5 = vmul.f32 %v579_v13, %v57_v1  ;;  %v2153_v14 = vld [vmem:[#allocation26_spill] sm:$0xff]  ;;  %v2154_v27 = vld [vmem:[#allocation44_spill] sm:$0xff] }
 0x2aa   :  { %691 = vmatpush.msrb.mxu0 %v632_v57  ;;  %804 = vmatpush.msrb.mxu1 %v680_v3  ;;  %v560_v25 = vsub.f32 %v2153_v14, %v2152_v28  ;;  %v594_v46 = vmul.f32 %v562_v20, %v56_v9  ;;  %v610_v34 = vmul.f32 %v1099_v18, %v578_v16  ;;  %v2161_v2 = vld [vmem:[#allocation22_spill] sm:$0xff]  ;;  %v52_v3 = vld [vmem:[%s2039_s1] sm:$0xff]  ;;  %v152_v28 = vld [vmem:[%s2042_s4 + $0xf8] sm:$0xff] }
 0x2ab   :  { %v642_v0 = vmul.f32 %v1099_v18, %v562_v20  ;;  %v628_v56 = vsub.f32 %v596_v43, %v612_v21  ;;  %v676_v61 = vadd.f32 %v660_v40, %v644_v36  ;;  %v658_v11 = vmul.f32 %v578_v16, %v56_v9  ;;  %1159 = vmatpush.msrb.mxu3 %v152_v28  ;;  %v2172_v14 = vld [vmem:[#allocation15_spill] sm:$0xff] }
 0x2ac   :  { %692 = vmatpush.msrb.mxu0 %v631_v23  ;;  %805 = vmatpush.msrb.mxu1 %v679_v24  ;;  %v559_v33 = vsub.f32 %v2159_v62, %v2158_v35  ;;  %v593_v58 = vmul.f32 %v561_v37, %v55_v12  ;;  %v609_v42 = vmul.f32 %v1098_v15, %v577_v22  ;;  %v2178_v35 = vld [vmem:[#allocation21_spill] sm:$0xff] }
 0x2ad   :  { %v641_v45 = vmul.f32 %v1098_v15, %v561_v37  ;;  %v627_v63 = vsub.f32 %v595_v49, %v611_v52  ;;  %v675_v30 = vadd.f32 %v659_v5, %v643_v39  ;;  %v657_v55 = vmul.f32 %v577_v22, %v55_v12  ;;  %v2163_v22 = vld [vmem:[#allocation6_spill] sm:$0xff]  ;;  %v2164_v37 = vld [vmem:[#allocation7_spill] sm:$0xff]  ;;  %v2166_v49 = vld [vmem:[#allocation9_spill] sm:$0xff] }
 0x2ae   :  { %693 = vmatpush.msrb.mxu0 %v2151_v47  ;;  %806 = vmatpush.msrb.mxu1 %v1572_v59  ;;  %v2156_v59 = vsub.f32 %v2154_v27, %v2155_v38  ;;  %v558_v44 = vsub.f32 %v2161_v2, %v2160_v41  ;;  %v592_v51 = vmul.f32 %v560_v25, %v54_v53  ;;  %v2167_v47 = vld [vmem:[#allocation10_spill] sm:$0xff]  ;;  %v2168_v52 = vld [vmem:[#allocation11_spill] sm:$0xff]  ;;  %v2169_v39 = vld [vmem:[#allocation12_spill] sm:$0xff] }
 0x2af   :  { %v608_v50 = vmul.f32 %v1097_v31, %v576_v17  ;;  %v640_v8 = vmul.f32 %v1097_v31, %v560_v25  ;;  %v626_v26 = vsub.f32 %v594_v46, %v610_v34  ;;  %v674_v60 = vadd.f32 %v658_v11, %v642_v0  ;;  %v2170_v5 = vld [vmem:[#allocation13_spill] sm:$0xff]  ;;  %v2171_v12 = vld [vmem:[#allocation14_spill] sm:$0xff]  ;;  %v136_v15 = vld [vmem:[%s2042_s4 + $0x78] sm:$0xff] }
 0x2b0   :  { %694 = vmatpush.msrb.mxu0 %v2156_v59  ;;  %807 = vmatpush.msrb.mxu1 %v2157_v54  ;;  %v656_v57 = vmul.f32 %v576_v17, %v54_v53  ;;  %v591_v48 = vmul.f32 %v559_v33, %v53_v32  ;;  %v607_v10 = vmul.f32 %v1096_v29, %v1655_v6  ;;  %v2173_v25 = vld [vmem:[#allocation16_spill] sm:$0xff]  ;;  %v135_v46 = vld [vmem:[%s2042_s4 + $0x70] sm:$0xff]  ;;  %v2174_v0 = vld [vmem:[#allocation17_spill] sm:$0xff] }
 0x2b1   :  { %v639_v13 = vmul.f32 %v1096_v29, %v559_v33  ;;  %v625_v23 = vsub.f32 %v593_v58, %v609_v42  ;;  %v673_v24 = vadd.f32 %v657_v55, %v641_v45  ;;  %v655_v1 = vmul.f32 %v1655_v6, %v53_v32  ;;  %v2162_v6 = vld [vmem:[#allocation5_spill] sm:$0xff]  ;;  %1143 = vmatpush.msrb.mxu2 %v136_v15  ;;  %v151_v34 = vld [vmem:[%s2042_s4 + $0xf0] sm:$0xff]  ;;  %v2175_v27 = vld [vmem:[#allocation18_spill] sm:$0xff] }
 0x2b2   :  { %695 = vmatpush.msrb.mxu0 %v628_v56  ;;  %808 = vmatpush.msrb.mxu1 %v676_v61  ;;  %v590_v16 = vmul.f32 %v558_v44, %v52_v3  ;;  %v606_v20 = vmul.f32 %v1095_v4, %v1641_v7  ;;  %v638_v43 = vmul.f32 %v1095_v4, %v558_v44  ;;  %v134_v38 = vld [vmem:[%s2042_s4 + $0x68] sm:$0xff]  ;;  %v2176_v54 = vld [vmem:[#allocation19_spill] sm:$0xff]  ;;  %v2177_v56 = vld [vmem:[#allocation20_spill] sm:$0xff] }
 0x2b3   :  { %v624_v19 = vsub.f32 %v592_v51, %v608_v50  ;;  %v672_v21 = vadd.f32 %v656_v57, %v640_v8  ;;  %v654_v36 = vmul.f32 %v1641_v7, %v52_v3  ;;  %v623_v40 = vsub.f32 %v591_v48, %v607_v10  ;;  %v2165_v7 = vld [vmem:[#allocation8_spill] sm:$0xff]  ;;  %1144 = vmatpush.msrb.mxu2 %v135_v46  ;;  %v150_v59 = vld [vmem:[%s2042_s4 + $0xe8] sm:$0xff]  ;;  %v133_v61 = vld [vmem:[%s2042_s4 + $0x60] sm:$0xff] }
 0x2b4   :  { %696 = vmatpush.msrb.mxu0 %v627_v63  ;;  %809 = vmatpush.msrb.mxu1 %v675_v30  ;;  %v671_v9 = vadd.f32 %v655_v1, %v639_v13  ;;  %v622_v18 = vsub.f32 %v590_v16, %v606_v20  ;;  %v149_v11 = vld [vmem:[%s2042_s4 + $0xe0] sm:$0xff]  ;;  %v2179_v58 = vld [vmem:[#allocation23_spill] sm:$0xff]  ;;  %v132_v42 = vld [vmem:[%s2042_s4 + $0x58] sm:$0xff] }
 0x2b5   :  { %v670_v17 = vadd.f32 %v654_v36, %v638_v43  ;;  %1160 = vmatpush.msrb.mxu3 %v151_v34  ;;  %1145 = vmatpush.msrb.mxu2 %v134_v38  ;;  %v148_v45 = vld [vmem:[%s2042_s4 + $0xd8] sm:$0xff]  ;;  %v2180_v55 = vld [vmem:[#allocation25_spill] sm:$0xff]  ;;  %v2181_v41 = vld [vmem:[#allocation27_spill] sm:$0xff] }
 0x2b6   :  { %697 = vmatpush.msrb.mxu0 %v626_v26  ;;  %810 = vmatpush.msrb.mxu1 %v674_v60  ;;  %v131_v2 = vld [vmem:[%s2042_s4 + $0x50] sm:$0xff]  ;;  %v2182_v8 = vld [vmem:[#allocation28_spill] sm:$0xff]  ;;  %v2183_v57 = vld [vmem:[#allocation29_spill] sm:$0xff] }
 0x2b7   :  { %1161 = vmatpush.msrb.mxu3 %v150_v59  ;;  %1146 = vmatpush.msrb.mxu2 %v133_v61  ;;  %v147_v44 = vld [vmem:[%s2042_s4 + $0xd0] sm:$0xff]  ;;  %v130_v3 = vld [vmem:[%s2042_s4 + $0x48] sm:$0xff]  ;;  %v129_v16 = vld [vmem:[%s2042_s4 + $0x40] sm:$0xff] }
 0x2b8   :  { %698 = vmatpush.msrb.mxu0 %v625_v23  ;;  %811 = vmatpush.msrb.mxu1 %v673_v24  ;;  %v146_v4 = vld [vmem:[%s2042_s4 + $0xc8] sm:$0xff]  ;;  %v2185_v1 = vld [vmem:[#allocation31_spill] sm:$0xff]  ;;  %v145_v20 = vld [vmem:[%s2042_s4 + $0xc0] sm:$0xff] }
 0x2b9   :  { %1162 = vmatpush.msrb.mxu3 %v149_v11  ;;  %1147 = vmatpush.msrb.mxu2 %v132_v42  ;;  %v2184_v13 = vld [vmem:[#allocation30_spill] sm:$0xff] }
 0x2ba   :  { %699 = vmatpush.msrb.mxu0 %v624_v19  ;;  %812 = vmatpush.msrb.mxu1 %v672_v21  ;;  %v2186_v21 = vld [vmem:[#allocation32_spill] sm:$0xff] }
 0x2bb   :  { %1163 = vmatpush.msrb.mxu3 %v148_v45  ;;  %1148 = vmatpush.msrb.mxu2 %v131_v2 }
 0x2bc   :  { %700 = vmatpush.msrb.mxu0 %v623_v40  ;;  %813 = vmatpush.msrb.mxu1 %v671_v9  ;;  %v2187_v9 = vld [vmem:[#allocation33_spill] sm:$0xff] }
 0x2bd   :  { %1164 = vmatpush.msrb.mxu3 %v147_v44  ;;  %1149 = vmatpush.msrb.mxu2 %v130_v3 }
 0x2be   :  { %701 = vmatpush.msrb.mxu0 %v622_v18  ;;  %814 = vmatpush.msrb.mxu1 %v670_v17  ;;  %v128_v18 = vld [vmem:[%s2042_s4 + $0x38] sm:$0xff] }
 0x2bf   :  { %702 = vmatmul.f32.vlgmr.msrb.gmra.mxu0 %v2162_v6  ;;  %815 = vmatmul.f32.vlgmr.msrb.gmra.mxu1 %v2162_v6  ;;  %v144_v17 = vld [vmem:[%s2042_s4 + $0xb8] sm:$0xff] }
 0x2c0   :  { %944 = vmatpush.msra.mxu0 %v136_v15  ;;  %1009 = vmatpush.msra.mxu1 %v152_v28  ;;  %v141_v15 = vld [vmem:[%s2042_s4 + $0xa0] sm:$0xff]  ;;  %v2189_v28 = vld [vmem:[#allocation35_spill] sm:$0xff] }
 0x2c1   :  { %1165 = vmatpush.msrb.mxu3 %v146_v4  ;;  %1150 = vmatpush.msrb.mxu2 %v129_v16 }
 0x2c2   :  { %945 = vmatpush.msra.mxu0 %v135_v46  ;;  %1010 = vmatpush.msra.mxu1 %v151_v34  ;;  %v123_v46 = vld [vmem:[%s2042_s4 + $0x10] sm:$0xff] }
 0x2c3   :  { %1166 = vmatpush.msrb.mxu3 %v145_v20  ;;  %1151 = vmatpush.msrb.mxu2 %v128_v18  ;;  %v139_v34 = vld [vmem:[%s2042_s4 + $0x90] sm:$0xff] }
 0x2c4   :  { %946 = vmatpush.msra.mxu0 %v134_v38  ;;  %1011 = vmatpush.msra.mxu1 %v150_v59 }
 0x2c5   :  { %1167 = vmatpush.msrb.mxu3 %v144_v17 }
 0x2c6   :  { %947 = vmatpush.msra.mxu0 %v133_v61  ;;  %1012 = vmatpush.msra.mxu1 %v149_v11  ;;  %v2190_v61 = vld [vmem:[#allocation36_spill] sm:$0xff] }
 0x2c7   :  { %705 = vmatmul.f32.gmra.mxu0 %v2163_v22  ;;  %818 = vmatmul.f32.gmra.mxu1 %v2163_v22 }
 0x2c8   :  { %948 = vmatpush.msra.mxu0 %v132_v42  ;;  %1013 = vmatpush.msra.mxu1 %v148_v45 }
 0x2ca   :  { %949 = vmatpush.msra.mxu0 %v131_v2  ;;  %1014 = vmatpush.msra.mxu1 %v147_v44  ;;  %v2193_v44 = vld [vmem:[#allocation39_spill] sm:$0xff] }
 0x2cc   :  { %950 = vmatpush.msra.mxu0 %v130_v3  ;;  %1015 = vmatpush.msra.mxu1 %v146_v4 }
 0x2ce   :  { %951 = vmatpush.msra.mxu0 %v129_v16  ;;  %1016 = vmatpush.msra.mxu1 %v145_v20 }
 0x2cf   :  { %708 = vmatmul.f32.gmra.mxu0 %v2164_v37  ;;  %821 = vmatmul.f32.gmra.mxu1 %v2164_v37  ;;  %v2188_v37 = vld [vmem:[#allocation34_spill] sm:$0xff] }
 0x2d0   :  { %952 = vmatpush.msra.mxu0 %v128_v18  ;;  %1017 = vmatpush.msra.mxu1 %v144_v17 }
 0x2d7   :  { %711 = vmatmul.f32.gmra.mxu0 %v2165_v7  ;;  %824 = vmatmul.f32.gmra.mxu1 %v2165_v7  ;;  %v127_v7 = vld [vmem:[%s2042_s4 + $0x30] sm:$0xff] }
 0x2d8   :  { %953 = vmatpush.msra.mxu0 %v127_v7  ;;  %1152 = vmatpush.msrb.mxu2 %v127_v7 }
 0x2df   :  { %714 = vmatmul.f32.gmra.mxu0 %v2166_v49  ;;  %827 = vmatmul.f32.gmra.mxu1 %v2166_v49  ;;  %v143_v49 = vld [vmem:[%s2042_s4 + $0xb0] sm:$0xff] }
 0x2e0   :  { %1018 = vmatpush.msra.mxu1 %v143_v49  ;;  %1168 = vmatpush.msrb.mxu3 %v143_v49 }
 0x2e7   :  { %717 = vmatmul.f32.gmra.mxu0 %v2167_v47  ;;  %830 = vmatmul.f32.gmra.mxu1 %v2167_v47  ;;  %v126_v47 = vld [vmem:[%s2042_s4 + $0x28] sm:$0xff] }
 0x2e8   :  { %954 = vmatpush.msra.mxu0 %v126_v47  ;;  %1153 = vmatpush.msrb.mxu2 %v126_v47 }
 0x2ef   :  { %720 = vmatmul.f32.gmra.mxu0 %v2168_v52  ;;  %833 = vmatmul.f32.gmra.mxu1 %v2168_v52  ;;  %v142_v52 = vld [vmem:[%s2042_s4 + $0xa8] sm:$0xff] }
 0x2f0   :  { %1019 = vmatpush.msra.mxu1 %v142_v52  ;;  %1169 = vmatpush.msrb.mxu3 %v142_v52 }
 0x2f2   :  { %1020 = vmatpush.msra.mxu1 %v141_v15  ;;  %1170 = vmatpush.msrb.mxu3 %v141_v15 }
 0x2f7   :  { %723 = vmatmul.f32.gmra.mxu0 %v2169_v39  ;;  %836 = vmatmul.f32.gmra.mxu1 %v2169_v39 }
 0x2ff   :  { %726 = vmatmul.f32.gmra.mxu0 %v2170_v5  ;;  %839 = vmatmul.f32.gmra.mxu1 %v2170_v5 }
 0x307   :  { %729 = vmatmul.f32.gmra.mxu0 %v2171_v12  ;;  %842 = vmatmul.f32.gmra.mxu1 %v2171_v12  ;;  %v125_v12 = vld [vmem:[%s2042_s4 + $0x20] sm:$0xff] }
 0x308   :  { %955 = vmatpush.msra.mxu0 %v125_v12  ;;  %1154 = vmatpush.msrb.mxu2 %v125_v12 }
 0x30f   :  { %732 = vmatmul.f32.gmra.mxu0 %v2172_v14  ;;  %845 = vmatmul.f32.gmra.mxu1 %v2172_v14  ;;  %v124_v14 = vld [vmem:[%s2042_s4 + $0x18] sm:$0xff] }
 0x310   :  { %956 = vmatpush.msra.mxu0 %v124_v14  ;;  %1155 = vmatpush.msrb.mxu2 %v124_v14 }
 0x312   :  { %957 = vmatpush.msra.mxu0 %v123_v46  ;;  %1156 = vmatpush.msrb.mxu2 %v123_v46 }
 0x317   :  { %735 = vmatmul.f32.gmra.mxu0 %v2173_v25  ;;  %848 = vmatmul.f32.gmra.mxu1 %v2173_v25  ;;  %v140_v25 = vld [vmem:[%s2042_s4 + $0x98] sm:$0xff] }
 0x318   :  { %1021 = vmatpush.msra.mxu1 %v140_v25  ;;  %1171 = vmatpush.msrb.mxu3 %v140_v25 }
 0x31a   :  { %1022 = vmatpush.msra.mxu1 %v139_v34  ;;  %1172 = vmatpush.msrb.mxu3 %v139_v34 }
 0x31f   :  { %738 = vmatmul.f32.gmra.mxu0 %v2174_v0  ;;  %851 = vmatmul.f32.gmra.mxu1 %v2174_v0  ;;  %v122_v0 = vld [vmem:[%s2042_s4 + $0x8] sm:$0xff] }
 0x320   :  { %958 = vmatpush.msra.mxu0 %v122_v0  ;;  %1157 = vmatpush.msrb.mxu2 %v122_v0 }
 0x327   :  { %741 = vmatmul.f32.gmra.mxu0 %v2175_v27  ;;  %854 = vmatmul.f32.gmra.mxu1 %v2175_v27  ;;  %v138_v27 = vld [vmem:[%s2042_s4 + $0x88] sm:$0xff] }
 0x328   :  { %1023 = vmatpush.msra.mxu1 %v138_v27  ;;  %1173 = vmatpush.msrb.mxu3 %v138_v27 }
 0x32f   :  { %744 = vmatmul.f32.gmra.mxu0 %v2176_v54  ;;  %857 = vmatmul.f32.gmra.mxu1 %v2176_v54  ;;  %v121_v54 = vld [vmem:[%s2042_s4] sm:$0xff] }
 0x330   :  { %959 = vmatpush.msra.mxu0 %v121_v54  ;;  %1158 = vmatpush.msrb.mxu2 %v121_v54 }
 0x337   :  { %747 = vmatmul.f32.gmra.mxu0 %v2177_v56  ;;  %860 = vmatmul.f32.gmra.mxu1 %v2177_v56  ;;  %v137_v56 = vld [vmem:[%s2042_s4 + $0x80] sm:$0xff] }
 0x338   :  { %1024 = vmatpush.msra.mxu1 %v137_v56  ;;  %1174 = vmatpush.msrb.mxu3 %v137_v56 }
 0x33c   :  { %v1774_v53 = vpop.f32.mrf.mxu0  ;;  %v1776_v31 = vpop.f32.mrf.mxu1 }
 0x33f   :  { %750 = vmatmul.f32.gmra.mxu0 %v2178_v35  ;;  %863 = vmatmul.f32.gmra.mxu1 %v2178_v35 }
 0x344   :  { %v1780_v62 = vpop.f32.mrf.mxu0  ;;  %v1782_v33 = vpop.f32.mrf.mxu1 }
 0x347   :  { %753 = vmatmul.f32.gmra.mxu0 %v2179_v58  ;;  %866 = vmatmul.f32.gmra.mxu1 %v2179_v58  ;;  %v2191_v58 = vld [vmem:[#allocation37_spill] sm:$0xff] }
 0x34c   :  { %v1792_v63 = vpop.f32.mrf.mxu0  ;;  %v1794_v30 = vpop.f32.mrf.mxu1 }
 0x34f   :  { %756 = vmatmul.f32.gmra.mxu0 %v2180_v55  ;;  %869 = vmatmul.f32.gmra.mxu1 %v2180_v55  ;;  %v2192_v55 = vld [vmem:[#allocation38_spill] sm:$0xff] }
 0x354   :  { %v1798_v32 = vpop.f32.mrf.mxu0  ;;  %v1800_v29 = vpop.f32.mrf.mxu1 }
 0x357   :  { %759 = vmatmul.f32.gmra.mxu0 %v2181_v41  ;;  %872 = vmatmul.f32.gmra.mxu1 %v2181_v41 }
 0x35c   :  { %v1810_v51 = vpop.f32.mrf.mxu0  ;;  %v1812_v50 = vpop.f32.mrf.mxu1 }
 0x35f   :  { %762 = vmatmul.f32.gmra.mxu0 %v2182_v8  ;;  %875 = vmatmul.f32.gmra.mxu1 %v2182_v8 }
 0x364   :  { %v1816_v26 = vpop.f32.mrf.mxu0  ;;  %v1818_v60 = vpop.f32.mrf.mxu1 }
 0x367   :  { %765 = vmatmul.f32.gmra.mxu0 %v2183_v57  ;;  %878 = vmatmul.f32.gmra.mxu1 %v2183_v57 }
 0x36c   :  { %v1828_v48 = vpop.f32.mrf.mxu0  ;;  %v1830_v10 = vpop.f32.mrf.mxu1 }
 0x36f   :  { %768 = vmatmul.f32.gmra.mxu0 %v2184_v13  ;;  %881 = vmatmul.f32.gmra.mxu1 %v2184_v13 }
 0x374   :  { %v1834_v23 = vpop.f32.mrf.mxu0  ;;  %v1836_v24 = vpop.f32.mrf.mxu1 }
 0x377   :  { %771 = vmatmul.f32.gmra.mxu0 %v2185_v1  ;;  %884 = vmatmul.f32.gmra.mxu1 %v2185_v1 }
 0x37c   :  { %v1846_v43 = vpop.f32.mrf.mxu0  ;;  %v1848_v19 = vpop.f32.mrf.mxu1 }
 0x37f   :  { %774 = vmatmul.f32.gmra.mxu0 %v2186_v21  ;;  %887 = vmatmul.f32.gmra.mxu1 %v2186_v21 }
 0x384   :  { %v1852_v36 = vpop.f32.mrf.mxu0  ;;  %v1854_v40 = vpop.f32.mrf.mxu1 }
 0x387   :  { %777 = vmatmul.f32.gmra.mxu0 %v2187_v9  ;;  %890 = vmatmul.f32.gmra.mxu1 %v2187_v9 }
 0x38c   :  { %v1864_v6 = vpop.f32.mrf.mxu0  ;;  %v1866_v22 = vpop.f32.mrf.mxu1 }
 0x38f   :  { %780 = vmatmul.f32.gmra.mxu0 %v2188_v37  ;;  %893 = vmatmul.f32.gmra.mxu1 %v2188_v37 }
 0x394   :  { %v1882_v39 = vpop.f32.mrf.mxu0  ;;  %v1884_v5 = vpop.f32.mrf.mxu1 }
 0x397   :  { %783 = vmatmul.f32.gmra.mxu0 %v2189_v28  ;;  %896 = vmatmul.f32.gmra.mxu1 %v2189_v28 }
 0x39c   :  { %v1912_v38 = vpop.f32.mrf.mxu0  ;;  %v1914_v59 = vpop.f32.mrf.mxu1 }
 0x39f   :  { %786 = vmatmul.f32.gmra.mxu0 %v2190_v61  ;;  %899 = vmatmul.f32.gmra.mxu1 %v2190_v61 }
 0x3a4   :  { %v1924_v11 = vpop.f32.mrf.mxu0  ;;  %v1926_v35 = vpop.f32.mrf.mxu1 }
 0x3a7   :  { %789 = vmatmul.f32.gmra.mxu0 %v2191_v58  ;;  %902 = vmatmul.f32.gmra.mxu1 %v2191_v58 }
 0x3ac   :  { %v1930_v42 = vpop.f32.mrf.mxu0  ;;  %v1932_v45 = vpop.f32.mrf.mxu1 }
 0x3af   :  { %792 = vmatmul.f32.gmra.mxu0 %v2192_v55  ;;  %905 = vmatmul.f32.gmra.mxu1 %v2192_v55 }
 0x3b4   :  { %v1936_v41 = vpop.f32.mrf.mxu0  ;;  %v1938_v2 = vpop.f32.mrf.mxu1 }
 0x3b7   :  { %795 = vmatmul.f32.gmra.mxu0 %v2193_v44  ;;  %908 = vmatmul.f32.gmra.mxu1 %v2193_v44 }
 0x3bc   :  { %v751_v8 = vpop.f32.mrf.mxu0  ;;  %v864_v57 = vpop.f32.mrf.mxu1 }
 0x3bd   :  { %v928_v3 = vsub.f32 %v1776_v31, %v751_v8  ;;  %v912_v4 = vadd.f32 %v864_v57, %v1774_v53 }
 0x3bf   :  { %960 = vmatmul.f32.vlgmr.msra.gmra.mxu0 %v912_v4  ;;  %1025 = vmatmul.f32.vlgmr.msra.gmra.mxu1 %v928_v3 }
 0x3c4   :  { %v754_v13 = vpop.f32.mrf.mxu0  ;;  %v867_v1 = vpop.f32.mrf.mxu1 }
 0x3c5   :  { %v929_v16 = vsub.f32 %v1782_v33, %v754_v13  ;;  %v913_v20 = vadd.f32 %v867_v1, %v1780_v62 }
 0x3c7   :  { %963 = vmatmul.f32.vlgmr.msrb.gmra.mxu2 %v913_v20  ;;  %1028 = vmatmul.f32.vlgmr.msrb.gmra.mxu3 %v929_v16 }
 0x3cc   :  { %v757_v21 = vpop.f32.mrf.mxu0  ;;  %v870_v9 = vpop.f32.mrf.mxu1 }
 0x3cd   :  { %v930_v18 = vsub.f32 %v1794_v30, %v757_v21  ;;  %v914_v17 = vadd.f32 %v870_v9, %v1792_v63 }
 0x3cf   :  { %966 = vmatmul.f32.gmra.mxu2 %v914_v17  ;;  %1031 = vmatmul.f32.gmra.mxu3 %v930_v18 }
 0x3d4   :  { %v760_v31 = vpop.f32.mrf.mxu0  ;;  %v873_v53 = vpop.f32.mrf.mxu1 }
 0x3d5   :  { %v931_v37 = vsub.f32 %v1800_v29, %v760_v31  ;;  %v915_v7 = vadd.f32 %v873_v53, %v1798_v32 }
 0x3d7   :  { %969 = vmatmul.f32.gmra.mxu2 %v915_v7  ;;  %1034 = vmatmul.f32.gmra.mxu3 %v931_v37 }
 0x3dc   :  { %v763_v33 = vpop.f32.mrf.mxu0  ;;  %v876_v62 = vpop.f32.mrf.mxu1 }
 0x3dd   :  { %v932_v49 = vsub.f32 %v1812_v50, %v763_v33  ;;  %v916_v47 = vadd.f32 %v876_v62, %v1810_v51 }
 0x3df   :  { %972 = vmatmul.f32.gmra.mxu2 %v916_v47  ;;  %1037 = vmatmul.f32.gmra.mxu3 %v932_v49 }
 0x3e4   :  { %v766_v30 = vpop.f32.mrf.mxu0  ;;  %v879_v63 = vpop.f32.mrf.mxu1 }
 0x3e5   :  { %v933_v52 = vsub.f32 %v1818_v60, %v766_v30  ;;  %v917_v12 = vadd.f32 %v879_v63, %v1816_v26 }
 0x3e7   :  { %975 = vmatmul.f32.gmra.mxu2 %v917_v12  ;;  %1040 = vmatmul.f32.gmra.mxu3 %v933_v52 }
 0x3ec   :  { %v769_v29 = vpop.f32.mrf.mxu0  ;;  %v882_v32 = vpop.f32.mrf.mxu1 }
 0x3ed   :  { %v934_v15 = vsub.f32 %v1830_v10, %v769_v29  ;;  %v918_v28 = vadd.f32 %v882_v32, %v1828_v48 }
 0x3ef   :  { %978 = vmatmul.f32.gmra.mxu2 %v918_v28  ;;  %1043 = vmatmul.f32.gmra.mxu3 %v934_v15 }
 0x3f4   :  { %v772_v50 = vpop.f32.mrf.mxu0  ;;  %v885_v51 = vpop.f32.mrf.mxu1 }
 0x3f5   :  { %v935_v14 = vsub.f32 %v1836_v24, %v772_v50  ;;  %v919_v25 = vadd.f32 %v885_v51, %v1834_v23 }
 0x3f7   :  { %981 = vmatmul.f32.gmra.mxu2 %v919_v25  ;;  %1046 = vmatmul.f32.gmra.mxu3 %v935_v14 }
 0x3fc   :  { %v775_v60 = vpop.f32.mrf.mxu0  ;;  %v888_v26 = vpop.f32.mrf.mxu1 }
 0x3fd   :  { %v936_v46 = vsub.f32 %v1848_v19, %v775_v60  ;;  %v920_v34 = vadd.f32 %v888_v26, %v1846_v43 }
 0x3ff   :  { %984 = vmatmul.f32.gmra.mxu2 %v920_v34  ;;  %1049 = vmatmul.f32.gmra.mxu3 %v936_v46 }
 0x404   :  { %v778_v10 = vpop.f32.mrf.mxu0  ;;  %v891_v48 = vpop.f32.mrf.mxu1 }
 0x405   :  { %v937_v0 = vsub.f32 %v1854_v40, %v778_v10  ;;  %v921_v27 = vadd.f32 %v891_v48, %v1852_v36 }
 0x407   :  { %987 = vmatmul.f32.gmra.mxu2 %v921_v27  ;;  %1052 = vmatmul.f32.gmra.mxu3 %v937_v0 }
 0x40c   :  { %v781_v24 = vpop.f32.mrf.mxu0  ;;  %v894_v23 = vpop.f32.mrf.mxu1 }
 0x40d   :  { %v938_v54 = vsub.f32 %v1866_v22, %v781_v24  ;;  %v922_v56 = vadd.f32 %v894_v23, %v1864_v6 }
 0x40f   :  { %990 = vmatmul.f32.gmra.mxu2 %v922_v56  ;;  %1055 = vmatmul.f32.gmra.mxu3 %v938_v54 }
 0x414   :  { %v784_v19 = vpop.f32.mrf.mxu0  ;;  %v897_v43 = vpop.f32.mrf.mxu1 }
 0x415   :  { %v939_v61 = vsub.f32 %v1884_v5, %v784_v19  ;;  %v923_v58 = vadd.f32 %v897_v43, %v1882_v39 }
 0x417   :  { %993 = vmatmul.f32.gmra.mxu2 %v923_v58  ;;  %1058 = vmatmul.f32.gmra.mxu3 %v939_v61 }
 0x41c   :  { %v787_v40 = vpop.f32.mrf.mxu0  ;;  %v900_v36 = vpop.f32.mrf.mxu1 }
 0x41d   :  { %v940_v55 = vsub.f32 %v1914_v59, %v787_v40  ;;  %v924_v44 = vadd.f32 %v900_v36, %v1912_v38 }
 0x41f   :  { %996 = vmatmul.f32.gmra.mxu2 %v924_v44  ;;  %1061 = vmatmul.f32.gmra.mxu3 %v940_v55 }
 0x424   :  { %v790_v22 = vpop.f32.mrf.mxu0  ;;  %v903_v6 = vpop.f32.mrf.mxu1 }
 0x425   :  { %v941_v8 = vsub.f32 %v1926_v35, %v790_v22  ;;  %v925_v57 = vadd.f32 %v903_v6, %v1924_v11 }
 0x427   :  { %999 = vmatmul.f32.gmra.mxu2 %v925_v57  ;;  %1064 = vmatmul.f32.gmra.mxu3 %v941_v8 }
 0x42c   :  { %v793_v5 = vpop.f32.mrf.mxu0  ;;  %v906_v39 = vpop.f32.mrf.mxu1 }
 0x42d   :  { %v942_v3 = vsub.f32 %v1932_v45, %v793_v5  ;;  %v926_v4 = vadd.f32 %v906_v39, %v1930_v42 }
 0x42f   :  { %1002 = vmatmul.f32.gmra.mxu2 %v926_v4  ;;  %1067 = vmatmul.f32.gmra.mxu3 %v942_v3 }
 0x434   :  { %v796_v59 = vpop.f32.mrf.mxu0  ;;  %v909_v38 = vpop.f32.mrf.mxu1 }
 0x435   :  { %v943_v13 = vsub.f32 %v1938_v2, %v796_v59  ;;  %v927_v1 = vadd.f32 %v909_v38, %v1936_v41 }
 0x437   :  { %1005 = vmatmul.f32.gmra.mxu2 %v927_v1  ;;  %1070 = vmatmul.f32.gmra.mxu3 %v943_v13 }
 0x43c   :  { %v961_v35 = vpop.f32.mrf.mxu0  ;;  %v1026_v11 = vpop.f32.mrf.mxu1 }
 0x43d   :  { %v1027_v16 = vadd.f32 %v1026_v11, %v961_v35 }
 0x43f   :  { %1074 = vst.msk [vmem:[%s2043_s5] sm:$0xff] %vm153_vm0, %v1027_v16 }
 0x44a   :  { %v964_v45 = vpop.f32.mrf.mxu2  ;;  %v1029_v42 = vpop.f32.mrf.mxu3 }
 0x44b   :  { %v1030_v20 = vadd.f32 %v1029_v42, %v964_v45 }
 0x44d   :  { %1075 = vst.msk [vmem:[%s2043_s5 + $0x8] sm:$0xff] %vm153_vm0, %v1030_v20 }
 0x452   :  { %v967_v2 = vpop.f32.mrf.mxu2  ;;  %v1032_v41 = vpop.f32.mrf.mxu3 }
 0x453   :  { %v1033_v21 = vadd.f32 %v1032_v41, %v967_v2 }
 0x455   :  { %1076 = vst.msk [vmem:[%s2043_s5 + $0x10] sm:$0xff] %vm153_vm0, %v1033_v21 }
 0x45a   :  { %v970_v9 = vpop.f32.mrf.mxu2  ;;  %v1035_v18 = vpop.f32.mrf.mxu3 }
 0x45b   :  { %v1036_v17 = vadd.f32 %v1035_v18, %v970_v9 }
 0x45d   :  { %1077 = vst.msk [vmem:[%s2043_s5 + $0x18] sm:$0xff] %vm153_vm0, %v1036_v17 }
 0x462   :  { %v973_v31 = vpop.f32.mrf.mxu2  ;;  %v1038_v53 = vpop.f32.mrf.mxu3 }
 0x463   :  { %v1039_v37 = vadd.f32 %v1038_v53, %v973_v31 }
 0x465   :  { %1078 = vst.msk [vmem:[%s2043_s5 + $0x20] sm:$0xff] %vm153_vm0, %v1039_v37 }
 0x46a   :  { %v976_v7 = vpop.f32.mrf.mxu2  ;;  %v1041_v33 = vpop.f32.mrf.mxu3 }
 0x46b   :  { %v1042_v62 = vadd.f32 %v1041_v33, %v976_v7 }
 0x46d   :  { %1079 = vst.msk [vmem:[%s2043_s5 + $0x28] sm:$0xff] %vm153_vm0, %v1042_v62 }
 0x472   :  { %v979_v49 = vpop.f32.mrf.mxu2  ;;  %v1044_v47 = vpop.f32.mrf.mxu3 }
 0x473   :  { %v1045_v30 = vadd.f32 %v1044_v47, %v979_v49 }
 0x475   :  { %1080 = vst.msk [vmem:[%s2043_s5 + $0x30] sm:$0xff] %vm153_vm0, %v1045_v30 }
 0x47a   :  { %v982_v63 = vpop.f32.mrf.mxu2  ;;  %v1047_v52 = vpop.f32.mrf.mxu3 }
 0x47b   :  { %v1048_v12 = vadd.f32 %v1047_v52, %v982_v63 }
 0x47d   :  { %1081 = vst.msk [vmem:[%s2043_s5 + $0x38] sm:$0xff] %vm153_vm0, %v1048_v12 }
 0x482   :  { %v985_v29 = vpop.f32.mrf.mxu2  ;;  %v1050_v32 = vpop.f32.mrf.mxu3 }
 0x483   :  { %v1051_v15 = vadd.f32 %v1050_v32, %v985_v29 }
 0x485   :  { %1082 = vst.msk [vmem:[%s2043_s5 + $0x40] sm:$0xff] %vm153_vm0, %v1051_v15 }
 0x48a   :  { %v988_v28 = vpop.f32.mrf.mxu2  ;;  %v1053_v50 = vpop.f32.mrf.mxu3 }
 0x48b   :  { %v1054_v51 = vadd.f32 %v1053_v50, %v988_v28 }
 0x48d   :  { %1083 = vst.msk [vmem:[%s2043_s5 + $0x48] sm:$0xff] %vm153_vm0, %v1054_v51 }
 0x492   :  { %v991_v14 = vpop.f32.mrf.mxu2  ;;  %v1056_v25 = vpop.f32.mrf.mxu3 }
 0x493   :  { %v1057_v60 = vadd.f32 %v1056_v25, %v991_v14 }
 0x495   :  { %1084 = vst.msk [vmem:[%s2043_s5 + $0x50] sm:$0xff] %vm153_vm0, %v1057_v60 }
 0x49a   :  { %v994_v26 = vpop.f32.mrf.mxu2  ;;  %v1059_v46 = vpop.f32.mrf.mxu3 }
 0x49b   :  { %v1060_v34 = vadd.f32 %v1059_v46, %v994_v26 }
 0x49d   :  { %1085 = vst.msk [vmem:[%s2043_s5 + $0x58] sm:$0xff] %vm153_vm0, %v1060_v34 }
 0x4a2   :  { %v997_v10 = vpop.f32.mrf.mxu2  ;;  %v1062_v48 = vpop.f32.mrf.mxu3 }
 0x4a3   :  { %v1063_v0 = vadd.f32 %v1062_v48, %v997_v10 }
 0x4a5   :  { %1086 = vst.msk [vmem:[%s2043_s5 + $0x60] sm:$0xff] %vm153_vm0, %v1063_v0 }
 0x4aa   :  { %v1000_v27 = vpop.f32.mrf.mxu2  ;;  %v1065_v24 = vpop.f32.mrf.mxu3 }
 0x4ab   :  { %v1066_v23 = vadd.f32 %v1065_v24, %v1000_v27 }
 0x4ad   :  { %1087 = vst.msk [vmem:[%s2043_s5 + $0x68] sm:$0xff] %vm153_vm0, %v1066_v23 }
 0x4b2   :  { %v1003_v54 = vpop.f32.mrf.mxu2  ;;  %v1068_v56 = vpop.f32.mrf.mxu3 }
 0x4b3   :  { %v1069_v19 = vadd.f32 %v1068_v56, %v1003_v54 }
 0x4b5   :  { %1088 = vst.msk [vmem:[%s2043_s5 + $0x70] sm:$0xff] %vm153_vm0, %v1069_v19 }
 0x4ba   :  { %v1006_v43 = vpop.f32.mrf.mxu2  ;;  %v1071_v61 = vpop.f32.mrf.mxu3 }
 0x4bb   :  { %v1072_v58 = vadd.f32 %v1071_v61, %v1006_v43 }
 0x4bd   :  { %1089 = vst.msk [vmem:[%s2043_s5 + $0x78] sm:$0xff] %vm153_vm0, %v1072_v58 }
 0x4be   :  { %1094 = vsyncpa [#allocation3], 1 }

</bundles_post_ra>
